<compile_context>
chip_gen: v7x
topology: tpu7x:2x2x1
jax: 0.10.0
libtpu: 0.0.40
codegen_flags: <defaults>
</compile_context>

<pallas_src>
import numpy as np
import jax
import jax.numpy as jnp
from jax import lax
from jax.experimental import pallas as pl
from jax.experimental.pallas import tpu as pltpu

SIGMOID_EXPONENT = 2.0   # config.sigmoid_exponent
BETA = 0.5               # config.beta
BIAS_INIT = 0.1          # config.bias_init
RANDOM_NOISE = 0.01      # config.random_noise

# bf16 halves HBM traffic / VMEM blocks of the only large intermediate (review item);
# set to jnp.float32 for exact bit-parity with the f32 reference path.
INTERMEDIATE_DTYPE = jnp.bfloat16


# ------------------------- Kernel 1: time-parallel precompute ------------------------- #
def precompute_kernel(emb_ref, regex_ref, erg_ref, beta_ref, wrs_ref, bs_ref, lg_ref):
    """Rows = (timestep, batch) flattened; one row tile per grid step, fully parallel.

    Output is the fused intermediate [ l_vec | gate_pre ] of width R + 2*Ssum.
    """
    l_gen = jnp.tanh(jnp.dot(emb_ref[...], erg_ref[...],
                             preferred_element_type=jnp.float32))          # (T, R)
    beta = beta_ref[...]                                                    # (1, R)
    l_vec = regex_ref[...] * beta + l_gen * (1.0 - beta)                    # (T, R)
    # gate contribution from L: l_vec @ [Wrs1 | Wrs2] + [bs1 | bs2]
    g_pre = jnp.dot(l_vec, wrs_ref[...],
                    preferred_element_type=jnp.float32) + bs_ref[...]       # (T, 2*Ssum)
    lg_ref[...] = jnp.concatenate([l_vec, g_pre], axis=1).astype(lg_ref.dtype)


# --------------------------- Kernel 2: sequential recurrence --------------------------- #
def recurrence_kernel(lengths_ref, lg_ref, wss_ref, tr1wc_ref, tr2t_ref,
                      h0_ref, h1_ref, mat_ref, bias_ref, scores_ref,
                      hidden_sc, last_sc):
    """Grid = (batch_chunk [parallel], time_chunk [arbitrary]).

    Hidden state / masked 'last hidden' are carried across time chunks in VMEM scratch.
    """
    tc = pl.program_id(1)
    nt = pl.num_programs(1)
    TL, BB, F = lg_ref.shape
    Ssum = wss_ref.shape[0]
    R = tr2t_ref.shape[0]

    @pl.when(tc == 0)
    def _():
        hidden_sc[...] = jnp.broadcast_to(h0_ref[...], (BB, Ssum))
        last_sc[...] = jnp.zeros_like(last_sc)

    # Hoisted loop invariants (loaded / broadcast once per grid step).
    wss = wss_ref[...]            # (Ssum, 2*Ssum)   = [Wss1 | Wss2]
    tr1wc = tr1wc_ref[...]        # (Ssum, R+Ssum)   = [trans_r_1 | trans_wildcard]
    tr2t = tr2t_ref[...]          # (R, Ssum)        = trans_r_2.T (pre-transposed)
    batch_h1 = jnp.broadcast_to(h1_ref[...], (BB, Ssum))
    len_m1 = lengths_ref[...] - 1                                           # (BB, 1) int32
    t_base = tc * TL

    def step(i, carry):
        hidden, last = carry
        lg = lg_ref[i].astype(jnp.float32)                                  # (BB, F)
        l_vec = lg[:, :R]
        g_pre = lg[:, R:]
        # fused GRU-style gates: sigmoid(exponent * (hidden@[Wss1|Wss2] + precomputed))
        gates = jax.nn.sigmoid(
            (jnp.dot(hidden, wss, preferred_element_type=jnp.float32) + g_pre)
            * SIGMOID_EXPONENT)                                             # (BB, 2*Ssum)
        zt = gates[:, :Ssum]
        rt = gates[:, Ssum:]
        hidden_bar = (1.0 - rt) * batch_h1 + rt * hidden
        # fused transition matmul: hidden_bar @ [trans_r_1 | trans_wildcard]
        rw = jnp.dot(hidden_bar, tr1wc, preferred_element_type=jnp.float32)
        r_vec = rw[:, :R]                                                   # (BB, R)
        hidden_wildcard = rw[:, R:]                                         # (BB, Ssum)
        hidden_language = jnp.dot(l_vec * r_vec, tr2t,
                                  preferred_element_type=jnp.float32)
        hidden_new = jnp.maximum(hidden_language + hidden_wildcard, 0.0)    # clip_neg
        hidden_next = (1.0 - zt) * hidden + zt * hidden_new                 # farnn==1 update
        # fold out[arange(B), lengths-1] into the loop (steps past a sequence's length
        # never fire the mask, so ragged tail chunks are harmless)
        last = jnp.where(len_m1 == (t_base + i), hidden_next, last)
        return hidden_next, last

    hidden, last = lax.fori_loop(0, TL, step,
                                 (hidden_sc[...], last_sc[...]),
                                 unroll=min(8, TL))
    hidden_sc[...] = hidden
    last_sc[...] = last

    @pl.when(tc == nt - 1)
    def _():
        lh = jnp.clip(last, 0.0, 1.0)                                       # clamp_hidden
        sc = jnp.dot(lh, mat_ref[...], preferred_element_type=jnp.float32) + bias_ref[...]
        scores_ref[...] = jnp.clip(sc, 0.0, 1.0)                            # clamp_score


# ------------------------------------ JAX wrapper -------------------------------------- #
def _round_up(x, m):
    return ((x + m - 1) // m) * m


def intent_forward(token_ids, lengths, p):
    B, Lseq = token_ids.shape
    D = p["embedding"].shape[1]
    R = p["embed_r"].shape[1]
    Ssum = p["trans_wildcard"].shape[0]
    C = p["mat"].shape[1]
    F = R + 2 * Ssum

    # ---- batch chunking for the recurrence --------------------------------------------
    B8 = _round_up(B, 8)
    if B8 <= 16:
        BB = B8                                       # tiny batch: single chunk
    else:
        # big chunks (up to 256 rows under the same dependent-matmul latency), but keep
        # at least 2 chunks so the "parallel" axis can shard across v7x's 2 TensorCores.
        BB = max(8, (min(256, B8 // 2) // 8) * 8)
    B_pad = _round_up(B, BB)
    nb = B_pad // BB
    pad_b = B_pad - B

    # ---- time-major gather straight from transposed token ids (no activation transpose)
    tok_pad = jnp.pad(token_ids.astype(jnp.int32), ((0, pad_b), (0, 0)))    # (B_pad, L)
    lengths_p = jnp.pad(lengths.astype(jnp.int32), (0, pad_b), constant_values=1)
    lengths2d = lengths_p.reshape(B_pad, 1)
    tok_tm = tok_pad.T                                                       # (L, B_pad), tiny
    emb_tm = p["embedding"][tok_tm]                                          # (L, B_pad, D)
    regex_tm = p["embed_r"][tok_tm]                                          # (L, B_pad, R)

    N = Lseq * B_pad
    emb_flat = emb_tm.reshape(N, D)                                          # free reshape
    regex_flat = regex_tm.reshape(N, R)

    # Trace-time weight fusion / pre-transpose (constant-folded under jit).
    wrs_cat = jnp.concatenate([p["Wrs1"], p["Wrs2"]], axis=1)                # (R, 2*Ssum)
    bs_cat = jnp.concatenate([p["bs1"], p["bs2"]], axis=1)                   # (1, 2*Ssum)
    wss_cat = jnp.concatenate([p["Wss1"], p["Wss2"]], axis=1)                # (Ssum, 2*Ssum)
    tr1wc = jnp.concatenate([p["trans_r_1"], p["trans_wildcard"]], axis=1)   # (Ssum, R+Ssum)
    tr2t = p["trans_r_2"].T                                                  # (R, Ssum)

    # ---- Kernel 1: row-tiled, pipelined, parallel over row tiles -----------------------
    TILE_N = min(N, 1024)                      # N is a multiple of 8; ragged last tile OK
    grid_n = pl.cdiv(N, TILE_N)
    lg_flat = pl.pallas_call(
        precompute_kernel,
        out_shape=jax.ShapeDtypeStruct((N, F), INTERMEDIATE_DTYPE),
        grid_spec=pltpu.PrefetchScalarGridSpec(
            num_scalar_prefetch=0,
            grid=(grid_n,),
            in_specs=[pl.BlockSpec((TILE_N, D), lambda i: (i, 0)),
                      pl.BlockSpec((TILE_N, R), lambda i: (i, 0)),
                      pl.BlockSpec((D, R), lambda i: (0, 0)),
                      pl.BlockSpec((1, R), lambda i: (0, 0)),
                      pl.BlockSpec((R, 2 * Ssum), lambda i: (0, 0)),
                      pl.BlockSpec((1, 2 * Ssum), lambda i: (0, 0))],
            out_specs=pl.BlockSpec((TILE_N, F), lambda i: (i, 0))),
        compiler_params=pltpu.CompilerParams(dimension_semantics=("parallel",)),
    )(emb_flat, regex_flat, p["erg"], p["beta"], wrs_cat, bs_cat)

    lg_tm = lg_flat.reshape(Lseq, B_pad, F)    # free reshape (row-major)

    # ---- Kernel 2: recurrence; grid = (batch chunks [parallel], time chunks [arbitrary])
    # Time-chunk size chosen so the double-buffered lg block stays ~4 MiB (safe even under
    # v5e's 16 MiB scoped default and v7x's 64 MiB/TC), accounting for 128-lane padding.
    itemsize = jnp.dtype(INTERMEDIATE_DTYPE).itemsize
    bytes_per_step = BB * max(F, 128) * itemsize
    TL = int(max(1, min(Lseq, (4 * 1024 * 1024) // (2 * bytes_per_step))))
    nt = pl.cdiv(Lseq, TL)

    def wspec(shape):
        return pl.BlockSpec(shape, lambda b, t: (0, 0))

    scores_pad = pl.pallas_call(
        recurrence_kernel,
        out_shape=jax.ShapeDtypeStruct((B_pad, C), jnp.float32),
        grid_spec=pltpu.PrefetchScalarGridSpec(
            num_scalar_prefetch=0,
            grid=(nb, nt),
            in_specs=[
                pl.BlockSpec((BB, 1), lambda b, t: (b, 0)),          # lengths
                pl.BlockSpec((TL, BB, F), lambda b, t: (t, b, 0)),   # fused [l_vec|gate_pre]
                wspec((Ssum, 2 * Ssum)),   # [Wss1 | Wss2]
                wspec((Ssum, R + Ssum)),   # [trans_r_1 | trans_wildcard]
                wspec((R, Ssum)),          # trans_r_2.T
                wspec((1, Ssum)),          # h0
                wspec((1, Ssum)),          # h1
                wspec((Ssum, C)),          # mat
                wspec((1, C)),             # bias
            ],
            out_specs=pl.BlockSpec((BB, C), lambda b, t: (b, 0)),
            scratch_shapes=[pltpu.VMEM((BB, Ssum), jnp.float32),     # hidden carry
                            pltpu.VMEM((BB, Ssum), jnp.float32)]),   # last-hidden carry
        compiler_params=pltpu.CompilerParams(
            dimension_semantics=("parallel", "arbitrary")),
    )(lengths2d, lg_tm, wss_cat, tr1wc, tr2t,
      p["h0"], p["h1"], p["mat"], p["bias"])
    return scores_pad[:B]


# ------------------------------ parameter construction --------------------------------- #
def init_params(key, V, D, R, S, AS, C):
    Ssum = S + AS
    ks = jax.random.split(key, 16)

    def xavier(k, shape):
        std = (2.0 / (shape[0] + shape[1])) ** 0.5
        return (jax.random.normal(k, shape) * std).astype(jnp.float32)

    embedding = jax.random.normal(ks[0], (V, D), jnp.float32)
    embed_r = jax.random.normal(ks[1], (V, R), jnp.float32) * 0.5

    trans_r_1 = jnp.concatenate(
        [jax.random.normal(ks[2], (S, R)) * 0.3,
         jax.random.normal(ks[3], (AS, R)) * RANDOM_NOISE], axis=0).astype(jnp.float32)
    trans_r_2 = jnp.concatenate(
        [jax.random.normal(ks[4], (S, R)) * 0.3,
         jax.random.normal(ks[5], (AS, R)) * RANDOM_NOISE], axis=0).astype(jnp.float32)

    wc = jax.random.normal(ks[6], (Ssum, Ssum)) * RANDOM_NOISE
    wc = wc.at[:S, :S].set(jax.random.normal(ks[7], (S, S)) * 0.3).astype(jnp.float32)

    Wss1 = xavier(ks[8], (Ssum, Ssum))
    Wrs1 = xavier(ks[9], (R, Ssum))
    Wss2 = xavier(ks[10], (Ssum, Ssum))
    Wrs2 = xavier(ks[11], (R, Ssum))
    bs1 = jnp.full((1, Ssum), BIAS_INIT, jnp.float32)
    bs2 = jnp.full((1, Ssum), BIAS_INIT, jnp.float32)
    beta_vec = jnp.full((1, R), BETA, jnp.float32)

    h0 = jnp.zeros((1, Ssum), jnp.float32).at[0, 0].set(1.0)
    h1 = (jax.random.normal(ks[12], (1, Ssum)) * 0.1).astype(jnp.float32)

    mat = jnp.concatenate(
        [jax.random.normal(ks[13], (S, C)) * 0.3,
         jax.random.normal(ks[14], (AS, C)) * RANDOM_NOISE], axis=0).astype(jnp.float32)
    bias = (jax.random.normal(ks[15], (1, C)) * 0.1).astype(jnp.float32)

    # embed_r_generalized = pinv(embedding) @ embed_r   (D, R)  — init-time only.
    erg = jnp.asarray(
        np.linalg.pinv(np.asarray(embedding)) @ np.asarray(embed_r), jnp.float32)

    return dict(embedding=embedding, embed_r=embed_r, erg=erg, beta=beta_vec,
                Wss1=Wss1, Wrs1=Wrs1, bs1=bs1, Wss2=Wss2, Wrs2=Wrs2, bs2=bs2,
                trans_r_1=trans_r_1, trans_r_2=trans_r_2, trans_wildcard=wc,
                h0=h0, h1=h1, mat=mat, bias=bias)


# -------------------------------- pure-JAX reference ------------------------------------ #
def reference_forward(token_ids, lengths, p):
    all_emb = p["embedding"][token_ids]
    all_regex = p["embed_r"][token_ids]
    B, Lseq, _ = all_emb.shape
    Ssum = p["trans_wildcard"].shape[0]
    hidden = jnp.broadcast_to(p["h0"], (B, Ssum))
    batch_h1 = jnp.broadcast_to(p["h1"], (B, Ssum))
    last = jnp.zeros((B, Ssum), jnp.float32)
    for i in range(Lseq):
        emb = all_emb[:, i, :]
        l_gen = jnp.tanh(emb @ p["erg"])
        l = all_regex[:, i, :] * p["beta"] + l_gen * (1.0 - p["beta"])
        zt = jax.nn.sigmoid((hidden @ p["Wss1"] + l @ p["Wrs1"] + p["bs1"]) * SIGMOID_EXPONENT)
        rt = jax.nn.sigmoid((hidden @ p["Wss2"] + l @ p["Wrs2"] + p["bs2"]) * SIGMOID_EXPONENT)
        hbar = (1.0 - rt) * batch_h1 + rt * hidden
        r = hbar @ p["trans_r_1"]
        h_ = jnp.maximum((l * r) @ p["trans_r_2"].T + hbar @ p["trans_wildcard"], 0.0)
        hidden = (1.0 - zt) * hidden + zt * h_
        last = jnp.where((lengths - 1)[:, None] == i, hidden, last)
    lh = jnp.clip(last, 0.0, 1.0)
    return jnp.clip(lh @ p["mat"] + p["bias"], 0.0, 1.0)


if __name__ == "__main__":
    key = jax.random.PRNGKey(0)
    V, D, R, S, AS, C = 50, 16, 8, 5, 3, 4     # vocab, embed, rank, states, extra states, classes
    B, Lseq = 2, 8
    pk, ik = jax.random.split(key, 2)

    params = init_params(pk, V, D, R, S, AS, C)
    token_ids = jax.random.randint(ik, (B, Lseq), 0, V, dtype=jnp.int32)
    lengths = jnp.array([Lseq, 5], dtype=jnp.int32)

    fwd = jax.jit(intent_forward)
    scores = fwd(token_ids, lengths, params)
    scores = jax.block_until_ready(scores)

    ref = reference_forward(token_ids, lengths, params)
    np.testing.assert_allclose(np.asarray(scores), np.asarray(ref), atol=2e-2, rtol=2e-2)
    print("KERNEL_OK")
</pallas_src>

<mosaic_0001>
module attributes {stable_mosaic.version = 11 : i64} {
  func.func @precompute_kernel(%arg0: i32, %arg1: memref<64x16xf32, #tpu.memory_space<vmem>>, %arg2: memref<64x8xf32, #tpu.memory_space<vmem>>, %arg3: memref<16x8xf32, #tpu.memory_space<vmem>>, %arg4: memref<1x8xf32, #tpu.memory_space<vmem>>, %arg5: memref<8x16xf32, #tpu.memory_space<vmem>>, %arg6: memref<1x16xf32, #tpu.memory_space<vmem>>, %arg7: memref<64x24xbf16, #tpu.memory_space<vmem>>) attributes {dimension_semantics = [#tpu.dimension_semantics<parallel>], iteration_bounds = array<i64: 1>, scalar_prefetch = 0 : i64, scratch_operands = 0 : i64, tpu.core_type = #tpu.core_type<tc>, window_params = [{transform_indices = @transform_0, window_bounds = array<i64: 64, 16>}, {transform_indices = @transform_1, window_bounds = array<i64: 64, 8>}, {pipeline_mode = #tpu.pipeline_mode<synchronous>, transform_indices = @transform_2, window_bounds = array<i64: 16, 8>}, {pipeline_mode = #tpu.pipeline_mode<synchronous>, transform_indices = @transform_3, window_bounds = array<i64: 1, 8>}, {pipeline_mode = #tpu.pipeline_mode<synchronous>, transform_indices = @transform_4, window_bounds = array<i64: 8, 16>}, {pipeline_mode = #tpu.pipeline_mode<synchronous>, transform_indices = @transform_5, window_bounds = array<i64: 1, 16>}, {transform_indices = @transform_6, window_bounds = array<i64: 64, 24>}]} {
    %c0 = arith.constant 0 : index
    %c0_0 = arith.constant 0 : index
    %0 = vector.load %arg1[%c0, %c0_0] : memref<64x16xf32, #tpu.memory_space<vmem>>, vector<64x16xf32>
    %c0_1 = arith.constant 0 : index
    %c0_2 = arith.constant 0 : index
    %1 = vector.load %arg3[%c0_1, %c0_2] : memref<16x8xf32, #tpu.memory_space<vmem>>, vector<16x8xf32>
    %cst = arith.constant dense<0.000000e+00> : vector<64x8xf32>
    %2 = tpu.matmul %0, %1, %cst {dimension_numbers = #tpu.dot_dimension_numbers<[1], [0], [0], [1], [0, 0, 1, 1], [], []>} : vector<64x16xf32>, vector<16x8xf32>, vector<64x8xf32> -> vector<64x8xf32>
    %3 = math.tanh %2 : vector<64x8xf32>
    %c0_3 = arith.constant 0 : index
    %c0_4 = arith.constant 0 : index
    %4 = vector.load %arg4[%c0_3, %c0_4] : memref<1x8xf32, #tpu.memory_space<vmem>>, vector<1x8xf32>
    %c0_5 = arith.constant 0 : index
    %c0_6 = arith.constant 0 : index
    %5 = vector.load %arg2[%c0_5, %c0_6] : memref<64x8xf32, #tpu.memory_space<vmem>>, vector<64x8xf32>
    %6 = vector.broadcast %4 : vector<1x8xf32> to vector<64x8xf32>
    %7 = arith.mulf %5, %6 : vector<64x8xf32>
    %cst_7 = arith.constant 1.000000e+00 : f32
    %8 = vector.broadcast %cst_7 : f32 to vector<1x8xf32>
    %9 = arith.subf %8, %4 : vector<1x8xf32>
    %10 = vector.broadcast %9 : vector<1x8xf32> to vector<64x8xf32>
    %11 = arith.mulf %3, %10 : vector<64x8xf32>
    %12 = arith.addf %7, %11 : vector<64x8xf32>
    %c0_8 = arith.constant 0 : index
    %c0_9 = arith.constant 0 : index
    %13 = vector.load %arg5[%c0_8, %c0_9] : memref<8x16xf32, #tpu.memory_space<vmem>>, vector<8x16xf32>
    %cst_10 = arith.constant dense<0.000000e+00> : vector<64x16xf32>
    %14 = tpu.matmul %12, %13, %cst_10 {dimension_numbers = #tpu.dot_dimension_numbers<[1], [0], [0], [1], [0, 0, 1, 1], [], []>} : vector<64x8xf32>, vector<8x16xf32>, vector<64x16xf32> -> vector<64x16xf32>
    %c0_11 = arith.constant 0 : index
    %c0_12 = arith.constant 0 : index
    %15 = vector.load %arg6[%c0_11, %c0_12] : memref<1x16xf32, #tpu.memory_space<vmem>>, vector<1x16xf32>
    %16 = vector.broadcast %15 : vector<1x16xf32> to vector<64x16xf32>
    %17 = arith.addf %14, %16 : vector<64x16xf32>
    %18 = tpu.concatenate %12, %17 in 1 : vector<64x8xf32>, vector<64x16xf32> -> vector<64x24xf32>
    %19 = arith.truncf %18 : vector<64x24xf32> to vector<64x24xbf16>
    %c0_13 = arith.constant 0 : index
    %c0_14 = arith.constant 0 : index
    %20 = vector.load %arg7[%c0_13, %c0_14] : memref<64x24xbf16, #tpu.memory_space<vmem>>, vector<64x24xbf16>
    tpu.vector_store %arg7[%c0_13, %c0_14], %19 {strides = array<i32>} : memref<64x24xbf16, #tpu.memory_space<vmem>>, vector<64x24xbf16>,
    return
  }
  func.func @transform_0(%arg0: i32) -> (i32, i32) {
    %c0_i32 = arith.constant 0 : i32
    %c0_i32_0 = arith.constant 0 : i32
    return %arg0, %c0_i32 : i32, i32
  }
  func.func @transform_1(%arg0: i32) -> (i32, i32) {
    %c0_i32 = arith.constant 0 : i32
    %c0_i32_0 = arith.constant 0 : i32
    return %arg0, %c0_i32 : i32, i32
  }
  func.func @transform_2(%arg0: i32) -> (i32, i32) {
    %c0_i32 = arith.constant 0 : i32
    %c0_i32_0 = arith.constant 0 : i32
    %c0_i32_1 = arith.constant 0 : i32
    return %c0_i32, %c0_i32_0 : i32, i32
  }
  func.func @transform_3(%arg0: i32) -> (i32, i32) {
    %c0_i32 = arith.constant 0 : i32
    %c0_i32_0 = arith.constant 0 : i32
    %c0_i32_1 = arith.constant 0 : i32
    return %c0_i32, %c0_i32_0 : i32, i32
  }
  func.func @transform_4(%arg0: i32) -> (i32, i32) {
    %c0_i32 = arith.constant 0 : i32
    %c0_i32_0 = arith.constant 0 : i32
    %c0_i32_1 = arith.constant 0 : i32
    return %c0_i32, %c0_i32_0 : i32, i32
  }
  func.func @transform_5(%arg0: i32) -> (i32, i32) {
    %c0_i32 = arith.constant 0 : i32
    %c0_i32_0 = arith.constant 0 : i32
    %c0_i32_1 = arith.constant 0 : i32
    return %c0_i32, %c0_i32_0 : i32, i32
  }
  func.func @transform_6(%arg0: i32) -> (i32, i32) {
    %c0_i32 = arith.constant 0 : i32
    %c0_i32_0 = arith.constant 0 : i32
    return %arg0, %c0_i32 : i32, i32
  }
}

module attributes {stable_mosaic.version = 11 : i64} {
  func.func @recurrence_kernel(%arg0: i32, %arg1: i32, %arg2: memref<8x1xi32, #tpu.memory_space<vmem>>, %arg3: memref<8x8x24xbf16, #tpu.memory_space<vmem>>, %arg4: memref<8x16xf32, #tpu.memory_space<vmem>>, %arg5: memref<8x16xf32, #tpu.memory_space<vmem>>, %arg6: memref<8x8xf32, #tpu.memory_space<vmem>>, %arg7: memref<1x8xf32, #tpu.memory_space<vmem>>, %arg8: memref<1x8xf32, #tpu.memory_space<vmem>>, %arg9: memref<8x4xf32, #tpu.memory_space<vmem>>, %arg10: memref<1x4xf32, #tpu.memory_space<vmem>>, %arg11: memref<8x4xf32, #tpu.memory_space<vmem>>, %arg12: memref<8x8xf32, #tpu.memory_space<vmem>>, %arg13: memref<8x8xf32, #tpu.memory_space<vmem>>) attributes {dimension_semantics = [#tpu.dimension_semantics<parallel>, #tpu.dimension_semantics<arbitrary>], iteration_bounds = array<i64: 1, 1>, scalar_prefetch = 0 : i64, scratch_operands = 2 : i64, tpu.core_type = #tpu.core_type<tc>, window_params = [{transform_indices = @transform_0, window_bounds = array<i64: 8, 1>}, {transform_indices = @transform_1, window_bounds = array<i64: 8, 8, 24>}, {pipeline_mode = #tpu.pipeline_mode<synchronous>, transform_indices = @transform_2, window_bounds = array<i64: 8, 16>}, {pipeline_mode = #tpu.pipeline_mode<synchronous>, transform_indices = @transform_3, window_bounds = array<i64: 8, 16>}, {pipeline_mode = #tpu.pipeline_mode<synchronous>, transform_indices = @transform_4, window_bounds = array<i64: 8, 8>}, {pipeline_mode = #tpu.pipeline_mode<synchronous>, transform_indices = @transform_5, window_bounds = array<i64: 1, 8>}, {pipeline_mode = #tpu.pipeline_mode<synchronous>, transform_indices = @transform_6, window_bounds = array<i64: 1, 8>}, {pipeline_mode = #tpu.pipeline_mode<synchronous>, transform_indices = @transform_7, window_bounds = array<i64: 8, 4>}, {pipeline_mode = #tpu.pipeline_mode<synchronous>, transform_indices = @transform_8, window_bounds = array<i64: 1, 4>}, {transform_indices = @transform_9, window_bounds = array<i64: 8, 4>}]} {
    %c0_i32 = arith.constant 0 : i32
    %0 = arith.cmpi eq, %arg1, %c0_i32 : i32
    %1 = arith.extui %0 : i1 to i32
    %c0_i32_0 = arith.constant 0 : i32
    %2 = arith.cmpi ne, %1, %c0_i32_0 : i32
    scf.if %2 {
      %c0_102 = arith.constant 0 : index
      %c0_103 = arith.constant 0 : index
      %348 = vector.load %arg7[%c0_102, %c0_103] : memref<1x8xf32, #tpu.memory_space<vmem>>, vector<1x8xf32>
      %349 = vector.shape_cast %348 : vector<1x8xf32> to vector<1x8xf32>
      %350 = vector.broadcast %349 : vector<1x8xf32> to vector<8x8xf32>
      %c0_104 = arith.constant 0 : index
      %c0_105 = arith.constant 0 : index
      %351 = vector.load %arg12[%c0_104, %c0_105] : memref<8x8xf32, #tpu.memory_space<vmem>>, vector<8x8xf32>
      tpu.vector_store %arg12[%c0_104, %c0_105], %350 {strides = array<i32>} : memref<8x8xf32, #tpu.memory_space<vmem>>, vector<8x8xf32>,
      %cst_106 = arith.constant 0.000000e+00 : f32
      %352 = vector.broadcast %cst_106 : f32 to vector<8x8xf32>
      %c0_107 = arith.constant 0 : index
      %c0_108 = arith.constant 0 : index
      %353 = vector.load %arg13[%c0_107, %c0_108] : memref<8x8xf32, #tpu.memory_space<vmem>>, vector<8x8xf32>
      tpu.vector_store %arg13[%c0_107, %c0_108], %352 {strides = array<i32>} : memref<8x8xf32, #tpu.memory_space<vmem>>, vector<8x8xf32>,
    } else {
    }
    %c0 = arith.constant 0 : index
    %c0_1 = arith.constant 0 : index
    %3 = vector.load %arg4[%c0, %c0_1] : memref<8x16xf32, #tpu.memory_space<vmem>>, vector<8x16xf32>
    %c0_2 = arith.constant 0 : index
    %c0_3 = arith.constant 0 : index
    %4 = vector.load %arg5[%c0_2, %c0_3] : memref<8x16xf32, #tpu.memory_space<vmem>>, vector<8x16xf32>
    %c0_4 = arith.constant 0 : index
    %c0_5 = arith.constant 0 : index
    %5 = vector.load %arg6[%c0_4, %c0_5] : memref<8x8xf32, #tpu.memory_space<vmem>>, vector<8x8xf32>
    %c0_6 = arith.constant 0 : index
    %c0_7 = arith.constant 0 : index
    %6 = vector.load %arg8[%c0_6, %c0_7] : memref<1x8xf32, #tpu.memory_space<vmem>>, vector<1x8xf32>
    %7 = vector.shape_cast %6 : vector<1x8xf32> to vector<1x8xf32>
    %8 = vector.broadcast %7 : vector<1x8xf32> to vector<8x8xf32>
    %c0_8 = arith.constant 0 : index
    %c0_9 = arith.constant 0 : index
    %9 = vector.load %arg2[%c0_8, %c0_9] : memref<8x1xi32, #tpu.memory_space<vmem>>, vector<8x1xi32>
    %c1_i32 = arith.constant 1 : i32
    %10 = vector.broadcast %c1_i32 : i32 to vector<8x1xi32>
    %11 = arith.subi %9, %10 : vector<8x1xi32>
    %c8_i32 = arith.constant 8 : i32
    %12 = arith.muli %arg1, %c8_i32 : i32
    %c0_10 = arith.constant 0 : index
    %c0_11 = arith.constant 0 : index
    %13 = vector.load %arg12[%c0_10, %c0_11] : memref<8x8xf32, #tpu.memory_space<vmem>>, vector<8x8xf32>
    %c0_12 = arith.constant 0 : index
    %c0_13 = arith.constant 0 : index
    %14 = vector.load %arg13[%c0_12, %c0_13] : memref<8x8xf32, #tpu.memory_space<vmem>>, vector<8x8xf32>
    %c0_i32_14 = arith.constant 0 : i32
    %15 = arith.index_cast %c0_i32_14 : i32 to index
    %c0_15 = arith.constant 0 : index
    %c0_16 = arith.constant 0 : index
    %16 = vector.load %arg3[%15, %c0_15, %c0_16] : memref<8x8x24xbf16, #tpu.memory_space<vmem>>, vector<1x8x24xbf16>
    %17 = vector.shape_cast %16 : vector<1x8x24xbf16> to vector<8x24xbf16>
    %18 = arith.extf %17 : vector<8x24xbf16> to vector<8x24xf32>
    %19 = vector.extract_strided_slice %18 {offsets = [0, 0], sizes = [8, 8], strides = [1, 1]} : vector<8x24xf32> to vector<8x8xf32>
    %20 = vector.extract_strided_slice %18 {offsets = [0, 8], sizes = [8, 16], strides = [1, 1]} : vector<8x24xf32> to vector<8x16xf32>
    %cst = arith.constant dense<0.000000e+00> : vector<8x16xf32>
    %21 = tpu.matmul %13, %3, %cst {dimension_numbers = #tpu.dot_dimension_numbers<[1], [0], [0], [1], [0, 0, 1, 1], [], []>} : vector<8x8xf32>, vector<8x16xf32>, vector<8x16xf32> -> vector<8x16xf32>
    %22 = arith.addf %21, %20 : vector<8x16xf32>
    %cst_17 = arith.constant 2.000000e+00 : f32
    %23 = vector.broadcast %cst_17 : f32 to vector<8x16xf32>
    %24 = arith.mulf %22, %23 : vector<8x16xf32>
    %25 = arith.negf %24 : vector<8x16xf32>
    %26 = math.exp %25 : vector<8x16xf32>
    %cst_18 = arith.constant 1.000000e+00 : f32
    %27 = vector.broadcast %cst_18 : f32 to vector<8x16xf32>
    %28 = arith.addf %27, %26 : vector<8x16xf32>
    %29 = arith.divf %27, %28 : vector<8x16xf32>
    %30 = vector.extract_strided_slice %29 {offsets = [0, 0], sizes = [8, 8], strides = [1, 1]} : vector<8x16xf32> to vector<8x8xf32>
    %31 = vector.extract_strided_slice %29 {offsets = [0, 8], sizes = [8, 8], strides = [1, 1]} : vector<8x16xf32> to vector<8x8xf32>
    %cst_19 = arith.constant 1.000000e+00 : f32
    %32 = vector.broadcast %cst_19 : f32 to vector<8x8xf32>
    %33 = arith.subf %32, %31 : vector<8x8xf32>
    %34 = arith.mulf %33, %8 : vector<8x8xf32>
    %35 = arith.mulf %31, %13 : vector<8x8xf32>
    %36 = arith.addf %34, %35 : vector<8x8xf32>
    %cst_20 = arith.constant dense<0.000000e+00> : vector<8x16xf32>
    %37 = tpu.matmul %36, %4, %cst_20 {dimension_numbers = #tpu.dot_dimension_numbers<[1], [0], [0], [1], [0, 0, 1, 1], [], []>} : vector<8x8xf32>, vector<8x16xf32>, vector<8x16xf32> -> vector<8x16xf32>
    %38 = vector.extract_strided_slice %37 {offsets = [0, 0], sizes = [8, 8], strides = [1, 1]} : vector<8x16xf32> to vector<8x8xf32>
    %39 = vector.extract_strided_slice %37 {offsets = [0, 8], sizes = [8, 8], strides = [1, 1]} : vector<8x16xf32> to vector<8x8xf32>
    %40 = arith.mulf %19, %38 : vector<8x8xf32>
    %cst_21 = arith.constant dense<0.000000e+00> : vector<8x8xf32>
    %41 = tpu.matmul %40, %5, %cst_21 {dimension_numbers = #tpu.dot_dimension_numbers<[1], [0], [0], [1], [0, 0, 1, 1], [], []>} : vector<8x8xf32>, vector<8x8xf32>, vector<8x8xf32> -> vector<8x8xf32>
    %42 = arith.addf %41, %39 : vector<8x8xf32>
    %cst_22 = arith.constant 0.000000e+00 : f32
    %43 = vector.broadcast %cst_22 : f32 to vector<8x8xf32>
    %44 = arith.maximumf %42, %43 : vector<8x8xf32>
    %cst_23 = arith.constant 1.000000e+00 : f32
    %45 = vector.broadcast %cst_23 : f32 to vector<8x8xf32>
    %46 = arith.subf %45, %30 : vector<8x8xf32>
    %47 = arith.mulf %46, %13 : vector<8x8xf32>
    %48 = arith.mulf %30, %44 : vector<8x8xf32>
    %49 = arith.addf %47, %48 : vector<8x8xf32>
    %50 = arith.addi %12, %c0_i32_14 : i32
    %51 = vector.broadcast %50 : i32 to vector<8x1xi32>
    %52 = arith.cmpi eq, %11, %51 : vector<8x1xi32>
    %53 = vector.shape_cast %52 : vector<8x1xi1> to vector<8x1xi1>
    %54 = vector.broadcast %53 : vector<8x1xi1> to vector<8x8xi1>
    %55 = arith.select %54, %49, %14 : vector<8x8xi1>, vector<8x8xf32>
    %c1_i32_24 = arith.constant 1 : i32
    %56 = arith.index_cast %c1_i32_24 : i32 to index
    %c0_25 = arith.constant 0 : index
    %c0_26 = arith.constant 0 : index
    %57 = vector.load %arg3[%56, %c0_25, %c0_26] : memref<8x8x24xbf16, #tpu.memory_space<vmem>>, vector<1x8x24xbf16>
    %58 = vector.shape_cast %57 : vector<1x8x24xbf16> to vector<8x24xbf16>
    %59 = arith.extf %58 : vector<8x24xbf16> to vector<8x24xf32>
    %60 = vector.extract_strided_slice %59 {offsets = [0, 0], sizes = [8, 8], strides = [1, 1]} : vector<8x24xf32> to vector<8x8xf32>
    %61 = vector.extract_strided_slice %59 {offsets = [0, 8], sizes = [8, 16], strides = [1, 1]} : vector<8x24xf32> to vector<8x16xf32>
    %cst_27 = arith.constant dense<0.000000e+00> : vector<8x16xf32>
    %62 = tpu.matmul %49, %3, %cst_27 {dimension_numbers = #tpu.dot_dimension_numbers<[1], [0], [0], [1], [0, 0, 1, 1], [], []>} : vector<8x8xf32>, vector<8x16xf32>, vector<8x16xf32> -> vector<8x16xf32>
    %63 = arith.addf %62, %61 : vector<8x16xf32>
    %cst_28 = arith.constant 2.000000e+00 : f32
    %64 = vector.broadcast %cst_28 : f32 to vector<8x16xf32>
    %65 = arith.mulf %63, %64 : vector<8x16xf32>
    %66 = arith.negf %65 : vector<8x16xf32>
    %67 = math.exp %66 : vector<8x16xf32>
    %cst_29 = arith.constant 1.000000e+00 : f32
    %68 = vector.broadcast %cst_29 : f32 to vector<8x16xf32>
    %69 = arith.addf %68, %67 : vector<8x16xf32>
    %70 = arith.divf %68, %69 : vector<8x16xf32>
    %71 = vector.extract_strided_slice %70 {offsets = [0, 0], sizes = [8, 8], strides = [1, 1]} : vector<8x16xf32> to vector<8x8xf32>
    %72 = vector.extract_strided_slice %70 {offsets = [0, 8], sizes = [8, 8], strides = [1, 1]} : vector<8x16xf32> to vector<8x8xf32>
    %cst_30 = arith.constant 1.000000e+00 : f32
    %73 = vector.broadcast %cst_30 : f32 to vector<8x8xf32>
    %74 = arith.subf %73, %72 : vector<8x8xf32>
    %75 = arith.mulf %74, %8 : vector<8x8xf32>
    %76 = arith.mulf %72, %49 : vector<8x8xf32>
    %77 = arith.addf %75, %76 : vector<8x8xf32>
    %cst_31 = arith.constant dense<0.000000e+00> : vector<8x16xf32>
    %78 = tpu.matmul %77, %4, %cst_31 {dimension_numbers = #tpu.dot_dimension_numbers<[1], [0], [0], [1], [0, 0, 1, 1], [], []>} : vector<8x8xf32>, vector<8x16xf32>, vector<8x16xf32> -> vector<8x16xf32>
    %79 = vector.extract_strided_slice %78 {offsets = [0, 0], sizes = [8, 8], strides = [1, 1]} : vector<8x16xf32> to vector<8x8xf32>
    %80 = vector.extract_strided_slice %78 {offsets = [0, 8], sizes = [8, 8], strides = [1, 1]} : vector<8x16xf32> to vector<8x8xf32>
    %81 = arith.mulf %60, %79 : vector<8x8xf32>
    %cst_32 = arith.constant dense<0.000000e+00> : vector<8x8xf32>
    %82 = tpu.matmul %81, %5, %cst_32 {dimension_numbers = #tpu.dot_dimension_numbers<[1], [0], [0], [1], [0, 0, 1, 1], [], []>} : vector<8x8xf32>, vector<8x8xf32>, vector<8x8xf32> -> vector<8x8xf32>
    %83 = arith.addf %82, %80 : vector<8x8xf32>
    %cst_33 = arith.constant 0.000000e+00 : f32
    %84 = vector.broadcast %cst_33 : f32 to vector<8x8xf32>
    %85 = arith.maximumf %83, %84 : vector<8x8xf32>
    %cst_34 = arith.constant 1.000000e+00 : f32
    %86 = vector.broadcast %cst_34 : f32 to vector<8x8xf32>
    %87 = arith.subf %86, %71 : vector<8x8xf32>
    %88 = arith.mulf %87, %49 : vector<8x8xf32>
    %89 = arith.mulf %71, %85 : vector<8x8xf32>
    %90 = arith.addf %88, %89 : vector<8x8xf32>
    %91 = arith.addi %12, %c1_i32_24 : i32
    %92 = vector.broadcast %91 : i32 to vector<8x1xi32>
    %93 = arith.cmpi eq, %11, %92 : vector<8x1xi32>
    %94 = vector.shape_cast %93 : vector<8x1xi1> to vector<8x1xi1>
    %95 = vector.broadcast %94 : vector<8x1xi1> to vector<8x8xi1>
    %96 = arith.select %95, %90, %55 : vector<8x8xi1>, vector<8x8xf32>
    %c2_i32 = arith.constant 2 : i32
    %97 = arith.index_cast %c2_i32 : i32 to index
    %c0_35 = arith.constant 0 : index
    %c0_36 = arith.constant 0 : index
    %98 = vector.load %arg3[%97, %c0_35, %c0_36] : memref<8x8x24xbf16, #tpu.memory_space<vmem>>, vector<1x8x24xbf16>
    %99 = vector.shape_cast %98 : vector<1x8x24xbf16> to vector<8x24xbf16>
    %100 = arith.extf %99 : vector<8x24xbf16> to vector<8x24xf32>
    %101 = vector.extract_strided_slice %100 {offsets = [0, 0], sizes = [8, 8], strides = [1, 1]} : vector<8x24xf32> to vector<8x8xf32>
    %102 = vector.extract_strided_slice %100 {offsets = [0, 8], sizes = [8, 16], strides = [1, 1]} : vector<8x24xf32> to vector<8x16xf32>
    %cst_37 = arith.constant dense<0.000000e+00> : vector<8x16xf32>
    %103 = tpu.matmul %90, %3, %cst_37 {dimension_numbers = #tpu.dot_dimension_numbers<[1], [0], [0], [1], [0, 0, 1, 1], [], []>} : vector<8x8xf32>, vector<8x16xf32>, vector<8x16xf32> -> vector<8x16xf32>
    %104 = arith.addf %103, %102 : vector<8x16xf32>
    %cst_38 = arith.constant 2.000000e+00 : f32
    %105 = vector.broadcast %cst_38 : f32 to vector<8x16xf32>
    %106 = arith.mulf %104, %105 : vector<8x16xf32>
    %107 = arith.negf %106 : vector<8x16xf32>
    %108 = math.exp %107 : vector<8x16xf32>
    %cst_39 = arith.constant 1.000000e+00 : f32
    %109 = vector.broadcast %cst_39 : f32 to vector<8x16xf32>
    %110 = arith.addf %109, %108 : vector<8x16xf32>
    %111 = arith.divf %109, %110 : vector<8x16xf32>
    %112 = vector.extract_strided_slice %111 {offsets = [0, 0], sizes = [8, 8], strides = [1, 1]} : vector<8x16xf32> to vector<8x8xf32>
    %113 = vector.extract_strided_slice %111 {offsets = [0, 8], sizes = [8, 8], strides = [1, 1]} : vector<8x16xf32> to vector<8x8xf32>
    %cst_40 = arith.constant 1.000000e+00 : f32
    %114 = vector.broadcast %cst_40 : f32 to vector<8x8xf32>
    %115 = arith.subf %114, %113 : vector<8x8xf32>
    %116 = arith.mulf %115, %8 : vector<8x8xf32>
    %117 = arith.mulf %113, %90 : vector<8x8xf32>
    %118 = arith.addf %116, %117 : vector<8x8xf32>
    %cst_41 = arith.constant dense<0.000000e+00> : vector<8x16xf32>
    %119 = tpu.matmul %118, %4, %cst_41 {dimension_numbers = #tpu.dot_dimension_numbers<[1], [0], [0], [1], [0, 0, 1, 1], [], []>} : vector<8x8xf32>, vector<8x16xf32>, vector<8x16xf32> -> vector<8x16xf32>
    %120 = vector.extract_strided_slice %119 {offsets = [0, 0], sizes = [8, 8], strides = [1, 1]} : vector<8x16xf32> to vector<8x8xf32>
    %121 = vector.extract_strided_slice %119 {offsets = [0, 8], sizes = [8, 8], strides = [1, 1]} : vector<8x16xf32> to vector<8x8xf32>
    %122 = arith.mulf %101, %120 : vector<8x8xf32>
    %cst_42 = arith.constant dense<0.000000e+00> : vector<8x8xf32>
    %123 = tpu.matmul %122, %5, %cst_42 {dimension_numbers = #tpu.dot_dimension_numbers<[1], [0], [0], [1], [0, 0, 1, 1], [], []>} : vector<8x8xf32>, vector<8x8xf32>, vector<8x8xf32> -> vector<8x8xf32>
    %124 = arith.addf %123, %121 : vector<8x8xf32>
    %cst_43 = arith.constant 0.000000e+00 : f32
    %125 = vector.broadcast %cst_43 : f32 to vector<8x8xf32>
    %126 = arith.maximumf %124, %125 : vector<8x8xf32>
    %cst_44 = arith.constant 1.000000e+00 : f32
    %127 = vector.broadcast %cst_44 : f32 to vector<8x8xf32>
    %128 = arith.subf %127, %112 : vector<8x8xf32>
    %129 = arith.mulf %128, %90 : vector<8x8xf32>
    %130 = arith.mulf %112, %126 : vector<8x8xf32>
    %131 = arith.addf %129, %130 : vector<8x8xf32>
    %132 = arith.addi %12, %c2_i32 : i32
    %133 = vector.broadcast %132 : i32 to vector<8x1xi32>
    %134 = arith.cmpi eq, %11, %133 : vector<8x1xi32>
    %135 = vector.shape_cast %134 : vector<8x1xi1> to vector<8x1xi1>
    %136 = vector.broadcast %135 : vector<8x1xi1> to vector<8x8xi1>
    %137 = arith.select %136, %131, %96 : vector<8x8xi1>, vector<8x8xf32>
    %c3_i32 = arith.constant 3 : i32
    %138 = arith.index_cast %c3_i32 : i32 to index
    %c0_45 = arith.constant 0 : index
    %c0_46 = arith.constant 0 : index
    %139 = vector.load %arg3[%138, %c0_45, %c0_46] : memref<8x8x24xbf16, #tpu.memory_space<vmem>>, vector<1x8x24xbf16>
    %140 = vector.shape_cast %139 : vector<1x8x24xbf16> to vector<8x24xbf16>
    %141 = arith.extf %140 : vector<8x24xbf16> to vector<8x24xf32>
    %142 = vector.extract_strided_slice %141 {offsets = [0, 0], sizes = [8, 8], strides = [1, 1]} : vector<8x24xf32> to vector<8x8xf32>
    %143 = vector.extract_strided_slice %141 {offsets = [0, 8], sizes = [8, 16], strides = [1, 1]} : vector<8x24xf32> to vector<8x16xf32>
    %cst_47 = arith.constant dense<0.000000e+00> : vector<8x16xf32>
    %144 = tpu.matmul %131, %3, %cst_47 {dimension_numbers = #tpu.dot_dimension_numbers<[1], [0], [0], [1], [0, 0, 1, 1], [], []>} : vector<8x8xf32>, vector<8x16xf32>, vector<8x16xf32> -> vector<8x16xf32>
    %145 = arith.addf %144, %143 : vector<8x16xf32>
    %cst_48 = arith.constant 2.000000e+00 : f32
    %146 = vector.broadcast %cst_48 : f32 to vector<8x16xf32>
    %147 = arith.mulf %145, %146 : vector<8x16xf32>
    %148 = arith.negf %147 : vector<8x16xf32>
    %149 = math.exp %148 : vector<8x16xf32>
    %cst_49 = arith.constant 1.000000e+00 : f32
    %150 = vector.broadcast %cst_49 : f32 to vector<8x16xf32>
    %151 = arith.addf %150, %149 : vector<8x16xf32>
    %152 = arith.divf %150, %151 : vector<8x16xf32>
    %153 = vector.extract_strided_slice %152 {offsets = [0, 0], sizes = [8, 8], strides = [1, 1]} : vector<8x16xf32> to vector<8x8xf32>
    %154 = vector.extract_strided_slice %152 {offsets = [0, 8], sizes = [8, 8], strides = [1, 1]} : vector<8x16xf32> to vector<8x8xf32>
    %cst_50 = arith.constant 1.000000e+00 : f32
    %155 = vector.broadcast %cst_50 : f32 to vector<8x8xf32>
    %156 = arith.subf %155, %154 : vector<8x8xf32>
    %157 = arith.mulf %156, %8 : vector<8x8xf32>
    %158 = arith.mulf %154, %131 : vector<8x8xf32>
    %159 = arith.addf %157, %158 : vector<8x8xf32>
    %cst_51 = arith.constant dense<0.000000e+00> : vector<8x16xf32>
    %160 = tpu.matmul %159, %4, %cst_51 {dimension_numbers = #tpu.dot_dimension_numbers<[1], [0], [0], [1], [0, 0, 1, 1], [], []>} : vector<8x8xf32>, vector<8x16xf32>, vector<8x16xf32> -> vector<8x16xf32>
    %161 = vector.extract_strided_slice %160 {offsets = [0, 0], sizes = [8, 8], strides = [1, 1]} : vector<8x16xf32> to vector<8x8xf32>
    %162 = vector.extract_strided_slice %160 {offsets = [0, 8], sizes = [8, 8], strides = [1, 1]} : vector<8x16xf32> to vector<8x8xf32>
    %163 = arith.mulf %142, %161 : vector<8x8xf32>
    %cst_52 = arith.constant dense<0.000000e+00> : vector<8x8xf32>
    %164 = tpu.matmul %163, %5, %cst_52 {dimension_numbers = #tpu.dot_dimension_numbers<[1], [0], [0], [1], [0, 0, 1, 1], [], []>} : vector<8x8xf32>, vector<8x8xf32>, vector<8x8xf32> -> vector<8x8xf32>
    %165 = arith.addf %164, %162 : vector<8x8xf32>
    %cst_53 = arith.constant 0.000000e+00 : f32
    %166 = vector.broadcast %cst_53 : f32 to vector<8x8xf32>
    %167 = arith.maximumf %165, %166 : vector<8x8xf32>
    %cst_54 = arith.constant 1.000000e+00 : f32
    %168 = vector.broadcast %cst_54 : f32 to vector<8x8xf32>
    %169 = arith.subf %168, %153 : vector<8x8xf32>
    %170 = arith.mulf %169, %131 : vector<8x8xf32>
    %171 = arith.mulf %153, %167 : vector<8x8xf32>
    %172 = arith.addf %170, %171 : vector<8x8xf32>
    %173 = arith.addi %12, %c3_i32 : i32
    %174 = vector.broadcast %173 : i32 to vector<8x1xi32>
    %175 = arith.cmpi eq, %11, %174 : vector<8x1xi32>
    %176 = vector.shape_cast %175 : vector<8x1xi1> to vector<8x1xi1>
    %177 = vector.broadcast %176 : vector<8x1xi1> to vector<8x8xi1>
    %178 = arith.select %177, %172, %137 : vector<8x8xi1>, vector<8x8xf32>
    %c4_i32 = arith.constant 4 : i32
    %179 = arith.index_cast %c4_i32 : i32 to index
    %c0_55 = arith.constant 0 : index
    %c0_56 = arith.constant 0 : index
    %180 = vector.load %arg3[%179, %c0_55, %c0_56] : memref<8x8x24xbf16, #tpu.memory_space<vmem>>, vector<1x8x24xbf16>
    %181 = vector.shape_cast %180 : vector<1x8x24xbf16> to vector<8x24xbf16>
    %182 = arith.extf %181 : vector<8x24xbf16> to vector<8x24xf32>
    %183 = vector.extract_strided_slice %182 {offsets = [0, 0], sizes = [8, 8], strides = [1, 1]} : vector<8x24xf32> to vector<8x8xf32>
    %184 = vector.extract_strided_slice %182 {offsets = [0, 8], sizes = [8, 16], strides = [1, 1]} : vector<8x24xf32> to vector<8x16xf32>
    %cst_57 = arith.constant dense<0.000000e+00> : vector<8x16xf32>
    %185 = tpu.matmul %172, %3, %cst_57 {dimension_numbers = #tpu.dot_dimension_numbers<[1], [0], [0], [1], [0, 0, 1, 1], [], []>} : vector<8x8xf32>, vector<8x16xf32>, vector<8x16xf32> -> vector<8x16xf32>
    %186 = arith.addf %185, %184 : vector<8x16xf32>
    %cst_58 = arith.constant 2.000000e+00 : f32
    %187 = vector.broadcast %cst_58 : f32 to vector<8x16xf32>
    %188 = arith.mulf %186, %187 : vector<8x16xf32>
    %189 = arith.negf %188 : vector<8x16xf32>
    %190 = math.exp %189 : vector<8x16xf32>
    %cst_59 = arith.constant 1.000000e+00 : f32
    %191 = vector.broadcast %cst_59 : f32 to vector<8x16xf32>
    %192 = arith.addf %191, %190 : vector<8x16xf32>
    %193 = arith.divf %191, %192 : vector<8x16xf32>
    %194 = vector.extract_strided_slice %193 {offsets = [0, 0], sizes = [8, 8], strides = [1, 1]} : vector<8x16xf32> to vector<8x8xf32>
    %195 = vector.extract_strided_slice %193 {offsets = [0, 8], sizes = [8, 8], strides = [1, 1]} : vector<8x16xf32> to vector<8x8xf32>
    %cst_60 = arith.constant 1.000000e+00 : f32
    %196 = vector.broadcast %cst_60 : f32 to vector<8x8xf32>
    %197 = arith.subf %196, %195 : vector<8x8xf32>
    %198 = arith.mulf %197, %8 : vector<8x8xf32>
    %199 = arith.mulf %195, %172 : vector<8x8xf32>
    %200 = arith.addf %198, %199 : vector<8x8xf32>
    %cst_61 = arith.constant dense<0.000000e+00> : vector<8x16xf32>
    %201 = tpu.matmul %200, %4, %cst_61 {dimension_numbers = #tpu.dot_dimension_numbers<[1], [0], [0], [1], [0, 0, 1, 1], [], []>} : vector<8x8xf32>, vector<8x16xf32>, vector<8x16xf32> -> vector<8x16xf32>
    %202 = vector.extract_strided_slice %201 {offsets = [0, 0], sizes = [8, 8], strides = [1, 1]} : vector<8x16xf32> to vector<8x8xf32>
    %203 = vector.extract_strided_slice %201 {offsets = [0, 8], sizes = [8, 8], strides = [1, 1]} : vector<8x16xf32> to vector<8x8xf32>
    %204 = arith.mulf %183, %202 : vector<8x8xf32>
    %cst_62 = arith.constant dense<0.000000e+00> : vector<8x8xf32>
    %205 = tpu.matmul %204, %5, %cst_62 {dimension_numbers = #tpu.dot_dimension_numbers<[1], [0], [0], [1], [0, 0, 1, 1], [], []>} : vector<8x8xf32>, vector<8x8xf32>, vector<8x8xf32> -> vector<8x8xf32>
    %206 = arith.addf %205, %203 : vector<8x8xf32>
    %cst_63 = arith.constant 0.000000e+00 : f32
    %207 = vector.broadcast %cst_63 : f32 to vector<8x8xf32>
    %208 = arith.maximumf %206, %207 : vector<8x8xf32>
    %cst_64 = arith.constant 1.000000e+00 : f32
    %209 = vector.broadcast %cst_64 : f32 to vector<8x8xf32>
    %210 = arith.subf %209, %194 : vector<8x8xf32>
    %211 = arith.mulf %210, %172 : vector<8x8xf32>
    %212 = arith.mulf %194, %208 : vector<8x8xf32>
    %213 = arith.addf %211, %212 : vector<8x8xf32>
    %214 = arith.addi %12, %c4_i32 : i32
    %215 = vector.broadcast %214 : i32 to vector<8x1xi32>
    %216 = arith.cmpi eq, %11, %215 : vector<8x1xi32>
    %217 = vector.shape_cast %216 : vector<8x1xi1> to vector<8x1xi1>
    %218 = vector.broadcast %217 : vector<8x1xi1> to vector<8x8xi1>
    %219 = arith.select %218, %213, %178 : vector<8x8xi1>, vector<8x8xf32>
    %c5_i32 = arith.constant 5 : i32
    %220 = arith.index_cast %c5_i32 : i32 to index
    %c0_65 = arith.constant 0 : index
    %c0_66 = arith.constant 0 : index
    %221 = vector.load %arg3[%220, %c0_65, %c0_66] : memref<8x8x24xbf16, #tpu.memory_space<vmem>>, vector<1x8x24xbf16>
    %222 = vector.shape_cast %221 : vector<1x8x24xbf16> to vector<8x24xbf16>
    %223 = arith.extf %222 : vector<8x24xbf16> to vector<8x24xf32>
    %224 = vector.extract_strided_slice %223 {offsets = [0, 0], sizes = [8, 8], strides = [1, 1]} : vector<8x24xf32> to vector<8x8xf32>
    %225 = vector.extract_strided_slice %223 {offsets = [0, 8], sizes = [8, 16], strides = [1, 1]} : vector<8x24xf32> to vector<8x16xf32>
    %cst_67 = arith.constant dense<0.000000e+00> : vector<8x16xf32>
    %226 = tpu.matmul %213, %3, %cst_67 {dimension_numbers = #tpu.dot_dimension_numbers<[1], [0], [0], [1], [0, 0, 1, 1], [], []>} : vector<8x8xf32>, vector<8x16xf32>, vector<8x16xf32> -> vector<8x16xf32>
    %227 = arith.addf %226, %225 : vector<8x16xf32>
    %cst_68 = arith.constant 2.000000e+00 : f32
    %228 = vector.broadcast %cst_68 : f32 to vector<8x16xf32>
    %229 = arith.mulf %227, %228 : vector<8x16xf32>
    %230 = arith.negf %229 : vector<8x16xf32>
    %231 = math.exp %230 : vector<8x16xf32>
    %cst_69 = arith.constant 1.000000e+00 : f32
    %232 = vector.broadcast %cst_69 : f32 to vector<8x16xf32>
    %233 = arith.addf %232, %231 : vector<8x16xf32>
    %234 = arith.divf %232, %233 : vector<8x16xf32>
    %235 = vector.extract_strided_slice %234 {offsets = [0, 0], sizes = [8, 8], strides = [1, 1]} : vector<8x16xf32> to vector<8x8xf32>
    %236 = vector.extract_strided_slice %234 {offsets = [0, 8], sizes = [8, 8], strides = [1, 1]} : vector<8x16xf32> to vector<8x8xf32>
    %cst_70 = arith.constant 1.000000e+00 : f32
    %237 = vector.broadcast %cst_70 : f32 to vector<8x8xf32>
    %238 = arith.subf %237, %236 : vector<8x8xf32>
    %239 = arith.mulf %238, %8 : vector<8x8xf32>
    %240 = arith.mulf %236, %213 : vector<8x8xf32>
    %241 = arith.addf %239, %240 : vector<8x8xf32>
    %cst_71 = arith.constant dense<0.000000e+00> : vector<8x16xf32>
    %242 = tpu.matmul %241, %4, %cst_71 {dimension_numbers = #tpu.dot_dimension_numbers<[1], [0], [0], [1], [0, 0, 1, 1], [], []>} : vector<8x8xf32>, vector<8x16xf32>, vector<8x16xf32> -> vector<8x16xf32>
    %243 = vector.extract_strided_slice %242 {offsets = [0, 0], sizes = [8, 8], strides = [1, 1]} : vector<8x16xf32> to vector<8x8xf32>
    %244 = vector.extract_strided_slice %242 {offsets = [0, 8], sizes = [8, 8], strides = [1, 1]} : vector<8x16xf32> to vector<8x8xf32>
    %245 = arith.mulf %224, %243 : vector<8x8xf32>
    %cst_72 = arith.constant dense<0.000000e+00> : vector<8x8xf32>
    %246 = tpu.matmul %245, %5, %cst_72 {dimension_numbers = #tpu.dot_dimension_numbers<[1], [0], [0], [1], [0, 0, 1, 1], [], []>} : vector<8x8xf32>, vector<8x8xf32>, vector<8x8xf32> -> vector<8x8xf32>
    %247 = arith.addf %246, %244 : vector<8x8xf32>
    %cst_73 = arith.constant 0.000000e+00 : f32
    %248 = vector.broadcast %cst_73 : f32 to vector<8x8xf32>
    %249 = arith.maximumf %247, %248 : vector<8x8xf32>
    %cst_74 = arith.constant 1.000000e+00 : f32
    %250 = vector.broadcast %cst_74 : f32 to vector<8x8xf32>
    %251 = arith.subf %250, %235 : vector<8x8xf32>
    %252 = arith.mulf %251, %213 : vector<8x8xf32>
    %253 = arith.mulf %235, %249 : vector<8x8xf32>
    %254 = arith.addf %252, %253 : vector<8x8xf32>
    %255 = arith.addi %12, %c5_i32 : i32
    %256 = vector.broadcast %255 : i32 to vector<8x1xi32>
    %257 = arith.cmpi eq, %11, %256 : vector<8x1xi32>
    %258 = vector.shape_cast %257 : vector<8x1xi1> to vector<8x1xi1>
    %259 = vector.broadcast %258 : vector<8x1xi1> to vector<8x8xi1>
    %260 = arith.select %259, %254, %219 : vector<8x8xi1>, vector<8x8xf32>
    %c6_i32 = arith.constant 6 : i32
    %261 = arith.index_cast %c6_i32 : i32 to index
    %c0_75 = arith.constant 0 : index
    %c0_76 = arith.constant 0 : index
    %262 = vector.load %arg3[%261, %c0_75, %c0_76] : memref<8x8x24xbf16, #tpu.memory_space<vmem>>, vector<1x8x24xbf16>
    %263 = vector.shape_cast %262 : vector<1x8x24xbf16> to vector<8x24xbf16>
    %264 = arith.extf %263 : vector<8x24xbf16> to vector<8x24xf32>
    %265 = vector.extract_strided_slice %264 {offsets = [0, 0], sizes = [8, 8], strides = [1, 1]} : vector<8x24xf32> to vector<8x8xf32>
    %266 = vector.extract_strided_slice %264 {offsets = [0, 8], sizes = [8, 16], strides = [1, 1]} : vector<8x24xf32> to vector<8x16xf32>
    %cst_77 = arith.constant dense<0.000000e+00> : vector<8x16xf32>
    %267 = tpu.matmul %254, %3, %cst_77 {dimension_numbers = #tpu.dot_dimension_numbers<[1], [0], [0], [1], [0, 0, 1, 1], [], []>} : vector<8x8xf32>, vector<8x16xf32>, vector<8x16xf32> -> vector<8x16xf32>
    %268 = arith.addf %267, %266 : vector<8x16xf32>
    %cst_78 = arith.constant 2.000000e+00 : f32
    %269 = vector.broadcast %cst_78 : f32 to vector<8x16xf32>
    %270 = arith.mulf %268, %269 : vector<8x16xf32>
    %271 = arith.negf %270 : vector<8x16xf32>
    %272 = math.exp %271 : vector<8x16xf32>
    %cst_79 = arith.constant 1.000000e+00 : f32
    %273 = vector.broadcast %cst_79 : f32 to vector<8x16xf32>
    %274 = arith.addf %273, %272 : vector<8x16xf32>
    %275 = arith.divf %273, %274 : vector<8x16xf32>
    %276 = vector.extract_strided_slice %275 {offsets = [0, 0], sizes = [8, 8], strides = [1, 1]} : vector<8x16xf32> to vector<8x8xf32>
    %277 = vector.extract_strided_slice %275 {offsets = [0, 8], sizes = [8, 8], strides = [1, 1]} : vector<8x16xf32> to vector<8x8xf32>
    %cst_80 = arith.constant 1.000000e+00 : f32
    %278 = vector.broadcast %cst_80 : f32 to vector<8x8xf32>
    %279 = arith.subf %278, %277 : vector<8x8xf32>
    %280 = arith.mulf %279, %8 : vector<8x8xf32>
    %281 = arith.mulf %277, %254 : vector<8x8xf32>
    %282 = arith.addf %280, %281 : vector<8x8xf32>
    %cst_81 = arith.constant dense<0.000000e+00> : vector<8x16xf32>
    %283 = tpu.matmul %282, %4, %cst_81 {dimension_numbers = #tpu.dot_dimension_numbers<[1], [0], [0], [1], [0, 0, 1, 1], [], []>} : vector<8x8xf32>, vector<8x16xf32>, vector<8x16xf32> -> vector<8x16xf32>
    %284 = vector.extract_strided_slice %283 {offsets = [0, 0], sizes = [8, 8], strides = [1, 1]} : vector<8x16xf32> to vector<8x8xf32>
    %285 = vector.extract_strided_slice %283 {offsets = [0, 8], sizes = [8, 8], strides = [1, 1]} : vector<8x16xf32> to vector<8x8xf32>
    %286 = arith.mulf %265, %284 : vector<8x8xf32>
    %cst_82 = arith.constant dense<0.000000e+00> : vector<8x8xf32>
    %287 = tpu.matmul %286, %5, %cst_82 {dimension_numbers = #tpu.dot_dimension_numbers<[1], [0], [0], [1], [0, 0, 1, 1], [], []>} : vector<8x8xf32>, vector<8x8xf32>, vector<8x8xf32> -> vector<8x8xf32>
    %288 = arith.addf %287, %285 : vector<8x8xf32>
    %cst_83 = arith.constant 0.000000e+00 : f32
    %289 = vector.broadcast %cst_83 : f32 to vector<8x8xf32>
    %290 = arith.maximumf %288, %289 : vector<8x8xf32>
    %cst_84 = arith.constant 1.000000e+00 : f32
    %291 = vector.broadcast %cst_84 : f32 to vector<8x8xf32>
    %292 = arith.subf %291, %276 : vector<8x8xf32>
    %293 = arith.mulf %292, %254 : vector<8x8xf32>
    %294 = arith.mulf %276, %290 : vector<8x8xf32>
    %295 = arith.addf %293, %294 : vector<8x8xf32>
    %296 = arith.addi %12, %c6_i32 : i32
    %297 = vector.broadcast %296 : i32 to vector<8x1xi32>
    %298 = arith.cmpi eq, %11, %297 : vector<8x1xi32>
    %299 = vector.shape_cast %298 : vector<8x1xi1> to vector<8x1xi1>
    %300 = vector.broadcast %299 : vector<8x1xi1> to vector<8x8xi1>
    %301 = arith.select %300, %295, %260 : vector<8x8xi1>, vector<8x8xf32>
    %c7_i32 = arith.constant 7 : i32
    %302 = arith.index_cast %c7_i32 : i32 to index
    %c0_85 = arith.constant 0 : index
    %c0_86 = arith.constant 0 : index
    %303 = vector.load %arg3[%302, %c0_85, %c0_86] : memref<8x8x24xbf16, #tpu.memory_space<vmem>>, vector<1x8x24xbf16>
    %304 = vector.shape_cast %303 : vector<1x8x24xbf16> to vector<8x24xbf16>
    %305 = arith.extf %304 : vector<8x24xbf16> to vector<8x24xf32>
    %306 = vector.extract_strided_slice %305 {offsets = [0, 0], sizes = [8, 8], strides = [1, 1]} : vector<8x24xf32> to vector<8x8xf32>
    %307 = vector.extract_strided_slice %305 {offsets = [0, 8], sizes = [8, 16], strides = [1, 1]} : vector<8x24xf32> to vector<8x16xf32>
    %cst_87 = arith.constant dense<0.000000e+00> : vector<8x16xf32>
    %308 = tpu.matmul %295, %3, %cst_87 {dimension_numbers = #tpu.dot_dimension_numbers<[1], [0], [0], [1], [0, 0, 1, 1], [], []>} : vector<8x8xf32>, vector<8x16xf32>, vector<8x16xf32> -> vector<8x16xf32>
    %309 = arith.addf %308, %307 : vector<8x16xf32>
    %cst_88 = arith.constant 2.000000e+00 : f32
    %310 = vector.broadcast %cst_88 : f32 to vector<8x16xf32>
    %311 = arith.mulf %309, %310 : vector<8x16xf32>
    %312 = arith.negf %311 : vector<8x16xf32>
    %313 = math.exp %312 : vector<8x16xf32>
    %cst_89 = arith.constant 1.000000e+00 : f32
    %314 = vector.broadcast %cst_89 : f32 to vector<8x16xf32>
    %315 = arith.addf %314, %313 : vector<8x16xf32>
    %316 = arith.divf %314, %315 : vector<8x16xf32>
    %317 = vector.extract_strided_slice %316 {offsets = [0, 0], sizes = [8, 8], strides = [1, 1]} : vector<8x16xf32> to vector<8x8xf32>
    %318 = vector.extract_strided_slice %316 {offsets = [0, 8], sizes = [8, 8], strides = [1, 1]} : vector<8x16xf32> to vector<8x8xf32>
    %cst_90 = arith.constant 1.000000e+00 : f32
    %319 = vector.broadcast %cst_90 : f32 to vector<8x8xf32>
    %320 = arith.subf %319, %318 : vector<8x8xf32>
    %321 = arith.mulf %320, %8 : vector<8x8xf32>
    %322 = arith.mulf %318, %295 : vector<8x8xf32>
    %323 = arith.addf %321, %322 : vector<8x8xf32>
    %cst_91 = arith.constant dense<0.000000e+00> : vector<8x16xf32>
    %324 = tpu.matmul %323, %4, %cst_91 {dimension_numbers = #tpu.dot_dimension_numbers<[1], [0], [0], [1], [0, 0, 1, 1], [], []>} : vector<8x8xf32>, vector<8x16xf32>, vector<8x16xf32> -> vector<8x16xf32>
    %325 = vector.extract_strided_slice %324 {offsets = [0, 0], sizes = [8, 8], strides = [1, 1]} : vector<8x16xf32> to vector<8x8xf32>
    %326 = vector.extract_strided_slice %324 {offsets = [0, 8], sizes = [8, 8], strides = [1, 1]} : vector<8x16xf32> to vector<8x8xf32>
    %327 = arith.mulf %306, %325 : vector<8x8xf32>
    %cst_92 = arith.constant dense<0.000000e+00> : vector<8x8xf32>
    %328 = tpu.matmul %327, %5, %cst_92 {dimension_numbers = #tpu.dot_dimension_numbers<[1], [0], [0], [1], [0, 0, 1, 1], [], []>} : vector<8x8xf32>, vector<8x8xf32>, vector<8x8xf32> -> vector<8x8xf32>
    %329 = arith.addf %328, %326 : vector<8x8xf32>
    %cst_93 = arith.constant 0.000000e+00 : f32
    %330 = vector.broadcast %cst_93 : f32 to vector<8x8xf32>
    %331 = arith.maximumf %329, %330 : vector<8x8xf32>
    %cst_94 = arith.constant 1.000000e+00 : f32
    %332 = vector.broadcast %cst_94 : f32 to vector<8x8xf32>
    %333 = arith.subf %332, %317 : vector<8x8xf32>
    %334 = arith.mulf %333, %295 : vector<8x8xf32>
    %335 = arith.mulf %317, %331 : vector<8x8xf32>
    %336 = arith.addf %334, %335 : vector<8x8xf32>
    %337 = arith.addi %12, %c7_i32 : i32
    %338 = vector.broadcast %337 : i32 to vector<8x1xi32>
    %339 = arith.cmpi eq, %11, %338 : vector<8x1xi32>
    %340 = vector.shape_cast %339 : vector<8x1xi1> to vector<8x1xi1>
    %341 = vector.broadcast %340 : vector<8x1xi1> to vector<8x8xi1>
    %342 = arith.select %341, %336, %301 : vector<8x8xi1>, vector<8x8xf32>
    %c8_i32_95 = arith.constant 8 : i32
    %c0_96 = arith.constant 0 : index
    %c0_97 = arith.constant 0 : index
    %343 = vector.load %arg12[%c0_96, %c0_97] : memref<8x8xf32, #tpu.memory_space<vmem>>, vector<8x8xf32>
    tpu.vector_store %arg12[%c0_96, %c0_97], %336 {strides = array<i32>} : memref<8x8xf32, #tpu.memory_space<vmem>>, vector<8x8xf32>,
    %c0_98 = arith.constant 0 : index
    %c0_99 = arith.constant 0 : index
    %344 = vector.load %arg13[%c0_98, %c0_99] : memref<8x8xf32, #tpu.memory_space<vmem>>, vector<8x8xf32>
    tpu.vector_store %arg13[%c0_98, %c0_99], %342 {strides = array<i32>} : memref<8x8xf32, #tpu.memory_space<vmem>>, vector<8x8xf32>,
    %c0_i32_100 = arith.constant 0 : i32
    %345 = arith.cmpi eq, %arg1, %c0_i32_100 : i32
    %346 = arith.extui %345 : i1 to i32
    %c0_i32_101 = arith.constant 0 : i32
    %347 = arith.cmpi ne, %346, %c0_i32_101 : i32
    scf.if %347 {
      %cst_102 = arith.constant 0.000000e+00 : f32
      %cst_103 = arith.constant 1.000000e+00 : f32
      %348 = vector.broadcast %cst_102 : f32 to vector<8x8xf32>
      %349 = arith.maximumf %348, %342 : vector<8x8xf32>
      %350 = vector.broadcast %cst_103 : f32 to vector<8x8xf32>
      %351 = arith.minimumf %350, %349 : vector<8x8xf32>
      %c0_104 = arith.constant 0 : index
      %c0_105 = arith.constant 0 : index
      %352 = vector.load %arg9[%c0_104, %c0_105] : memref<8x4xf32, #tpu.memory_space<vmem>>, vector<8x4xf32>
      %cst_106 = arith.constant dense<0.000000e+00> : vector<8x4xf32>
      %353 = tpu.matmul %351, %352, %cst_106 {dimension_numbers = #tpu.dot_dimension_numbers<[1], [0], [0], [1], [0, 0, 1, 1], [], []>} : vector<8x8xf32>, vector<8x4xf32>, vector<8x4xf32> -> vector<8x4xf32>
      %c0_107 = arith.constant 0 : index
      %c0_108 = arith.constant 0 : index
      %354 = vector.load %arg10[%c0_107, %c0_108] : memref<1x4xf32, #tpu.memory_space<vmem>>, vector<1x4xf32>
      %355 = vector.broadcast %354 : vector<1x4xf32> to vector<8x4xf32>
      %356 = arith.addf %353, %355 : vector<8x4xf32>
      %cst_109 = arith.constant 0.000000e+00 : f32
      %cst_110 = arith.constant 1.000000e+00 : f32
      %357 = vector.broadcast %cst_109 : f32 to vector<8x4xf32>
      %358 = arith.maximumf %357, %356 : vector<8x4xf32>
      %359 = vector.broadcast %cst_110 : f32 to vector<8x4xf32>
      %360 = arith.minimumf %359, %358 : vector<8x4xf32>
      %c0_111 = arith.constant 0 : index
      %c0_112 = arith.constant 0 : index
      %361 = vector.load %arg11[%c0_111, %c0_112] : memref<8x4xf32, #tpu.memory_space<vmem>>, vector<8x4xf32>
      tpu.vector_store %arg11[%c0_111, %c0_112], %360 {strides = array<i32>} : memref<8x4xf32, #tpu.memory_space<vmem>>, vector<8x4xf32>,
    } else {
    }
    return
  }
  func.func @transform_0(%arg0: i32, %arg1: i32) -> (i32, i32) {
    %c0_i32 = arith.constant 0 : i32
    %c0_i32_0 = arith.constant 0 : i32
    return %arg0, %c0_i32 : i32, i32
  }
  func.func @transform_1(%arg0: i32, %arg1: i32) -> (i32, i32, i32) {
    %c0_i32 = arith.constant 0 : i32
    %c0_i32_0 = arith.constant 0 : i32
    return %arg1, %arg0, %c0_i32 : i32, i32, i32
  }
  func.func @transform_2(%arg0: i32, %arg1: i32) -> (i32, i32) {
    %c0_i32 = arith.constant 0 : i32
    %c0_i32_0 = arith.constant 0 : i32
    %c0_i32_1 = arith.constant 0 : i32
    return %c0_i32, %c0_i32_0 : i32, i32
  }
  func.func @transform_3(%arg0: i32, %arg1: i32) -> (i32, i32) {
    %c0_i32 = arith.constant 0 : i32
    %c0_i32_0 = arith.constant 0 : i32
    %c0_i32_1 = arith.constant 0 : i32
    return %c0_i32, %c0_i32_0 : i32, i32
  }
  func.func @transform_4(%arg0: i32, %arg1: i32) -> (i32, i32) {
    %c0_i32 = arith.constant 0 : i32
    %c0_i32_0 = arith.constant 0 : i32
    %c0_i32_1 = arith.constant 0 : i32
    return %c0_i32, %c0_i32_0 : i32, i32
  }
  func.func @transform_5(%arg0: i32, %arg1: i32) -> (i32, i32) {
    %c0_i32 = arith.constant 0 : i32
    %c0_i32_0 = arith.constant 0 : i32
    %c0_i32_1 = arith.constant 0 : i32
    return %c0_i32, %c0_i32_0 : i32, i32
  }
  func.func @transform_6(%arg0: i32, %arg1: i32) -> (i32, i32) {
    %c0_i32 = arith.constant 0 : i32
    %c0_i32_0 = arith.constant 0 : i32
    %c0_i32_1 = arith.constant 0 : i32
    return %c0_i32, %c0_i32_0 : i32, i32
  }
  func.func @transform_7(%arg0: i32, %arg1: i32) -> (i32, i32) {
    %c0_i32 = arith.constant 0 : i32
    %c0_i32_0 = arith.constant 0 : i32
    %c0_i32_1 = arith.constant 0 : i32
    return %c0_i32, %c0_i32_0 : i32, i32
  }
  func.func @transform_8(%arg0: i32, %arg1: i32) -> (i32, i32) {
    %c0_i32 = arith.constant 0 : i32
    %c0_i32_0 = arith.constant 0 : i32
    %c0_i32_1 = arith.constant 0 : i32
    return %c0_i32, %c0_i32_0 : i32, i32
  }
  func.func @transform_9(%arg0: i32, %arg1: i32) -> (i32, i32) {
    %c0_i32 = arith.constant 0 : i32
    %c0_i32_0 = arith.constant 0 : i32
    return %arg0, %c0_i32 : i32, i32
  }
}

</mosaic_0001>

<bundles_post_ra>
// kernel: intent_forward.2
= control target key start
LH: loop header
LB: loop body
LE: loop exit
PB: predicated region body
PF: predicated region fallthrough
CT: control target
= control target key end

     0   :  { %vm33_vm0 = vcmask 130048   ;;  %v181_v12 = vlaneseq  ;;  %vm225_vm1 = vcmask 64512   ;;  %s563_s9 = smov 8   ;;  %vm427_vm2 = vcmask 191488   ;;  %s746_s2 = inlined_call_operand.vmem [shape: f32[16,8], index: 2, kind: input, shape index: {}]   ;;  %s747_s0 = inlined_call_operand.vmem [shape: f32[64,16], index: 0, kind: input, shape index: {}]   ;;  %s748_s4 = inlined_call_operand.vmem [shape: f32[8,16], index: 4, kind: input, shape index: {}]   ;;  %s749_s3 = inlined_call_operand.vmem [shape: f32[1,8], index: 3, kind: input, shape index: {}]   ;;  %s750_s1 = inlined_call_operand.vmem [shape: f32[64,8], index: 1, kind: input, shape index: {}]   ;;  %s751_s5 = inlined_call_operand.vmem [shape: f32[1,16], index: 5, kind: input, shape index: {}]   ;;  %s752_s6 = inlined_call_operand.vmem [shape: bf16[64,24], index: 6, kind: output, shape index: {}]  }
   0x1   :  { %v31_v0 = vld [vmem:[%s746_s2] sm:$0xff]  ;;  %v32_v1 = vld [vmem:[%s746_s2 + $0x8] sm:$0xff]  ;;  %v25_v5 = vld [vmem:[%s747_s0 + $0x10] sm:$0xff] }
   0x2   :  { %v23_v2 = vld [vmem:[%s747_s0] sm:$0xff]  ;;  %v522_v3 = vpack.c.bf16 %v32_v1, %v31_v0  ;;  %v24_v4 = vld [vmem:[%s747_s0 + $0x8] sm:$0xff]  ;;  %v26_v6 = vld [vmem:[%s747_s0 + $0x18] sm:$0xff]  ;;  %v182_v13 = vshrl.u32 %v181_v12, 7 }
   0x3   :  { %496 = vmatprep.mubr.msk.f32.mxu0 %vm33_vm0, %v23_v2  ;;  %v27_v7 = vld [vmem:[%s747_s0 + $0x20] sm:$0xff]  ;;  %v28_v8 = vld [vmem:[%s747_s0 + $0x28] sm:$0xff]  ;;  %v29_v9 = vld [vmem:[%s747_s0 + $0x30] sm:$0xff] }
   0x4   :  { %523 = vmatprep.subr.bf16.mxu0 %v522_v3  ;;  %v30_v10 = vld [vmem:[%s747_s0 + $0x38] sm:$0xff]  ;;  %v217_v11 = vld [vmem:[%s748_s4] sm:$0xff]  ;;  %v183_v17 = vsub.s32 0, %v182_v13  ;;  %v173_v26 = vld [vmem:[%s750_s1 + $0x8] sm:$0xff] }
   0x5   :  { %525 = vmatpush3.bf16.msra.mxu0 %v522_v3  ;;  %508 = vmatprep.subr.mxu1 %v217_v11  ;;  %v171_v16 = vld [vmem:[%s749_s3] sm:$0x1]  ;;  %v174_v33 = vld [vmem:[%s750_s1 + $0x10] sm:$0xff]  ;;  %v175_v36 = vld [vmem:[%s750_s1 + $0x18] sm:$0xff] }
   0x6   :  { %509 = vmatpush3.msra.mxu1 %v217_v11  ;;  %v194_v19 = vsub.f32 1.0, %v171_v16  ;;  %v184_v21 = vrot.slane %v171_v16, %v183_v17  ;;  %v172_v23 = vld [vmem:[%s750_s1] sm:$0xff]  ;;  %v177_v46 = vld [vmem:[%s750_s1 + $0x28] sm:$0xff]  ;;  %v178_v54 = vld [vmem:[%s750_s1 + $0x30] sm:$0xff] }
   0x7   :  { %v176_v44 = vld [vmem:[%s750_s1 + $0x20] sm:$0xff]  ;;  %v179_v56 = vld [vmem:[%s750_s1 + $0x38] sm:$0xff] }
   0x8   :  { %497 = vmatmul.mubr.msk.f32.vlgmr.msra.gmra.mrb[0].mxu0 %vm33_vm0, %v24_v4  ;;  %v199_v24 = vrot.slane %v194_v19, %v183_v17  ;;  %v186_v28 = vmul.f32 %v184_v21, %v172_v23  ;;  %v187_v31 = vmul.f32 %v184_v21, %v173_v26  ;;  %v188_v39 = vmul.f32 %v184_v21, %v174_v33  ;;  %v448_v3 = vld [vmem:[%s751_s5] ss:$0 sm:$0xff] }
   0x9   :  { %499 = vmatprep.mubr.msk.f32.mxu0 %vm33_vm0, %v25_v5  ;;  %v189_v42 = vmul.f32 %v184_v21, %v175_v36  ;;  %v190_v49 = vmul.f32 %v184_v21, %v176_v44  ;;  %v191_v52 = vmul.f32 %v184_v21, %v177_v46  ;;  %v192_v59 = vmul.f32 %v184_v21, %v178_v54 }
   0xa   :  { %v193_v62 = vmul.f32 %v184_v21, %v179_v56 }
   0xc   :  { %500 = vmatmul.mubr.msk.f32.gmra.mrb[2].mxu0 %vm33_vm0, %v26_v6 }
   0xd   :  { %502 = vmatprep.mubr.msk.f32.mxu0 %vm33_vm0, %v27_v7 }
  0x10   :  { %503 = vmatmul.mubr.msk.f32.gmra.mrb[4].mxu0 %vm33_vm0, %v28_v8 }
  0x11   :  { %505 = vmatprep.mubr.msk.f32.mxu0 %vm33_vm0, %v29_v9 }
  0x14   :  { %506 = vmatmul.mubr.msk.f32.gmra.mrb[6].mxu0 %vm33_vm0, %v30_v10 }
  0xdb   :  { %v498_v14 = vpop.f32.mrb[0].mxu0 }
  0xdc   :  { %547 = vtanh.f32 %v498_v14  ;;  %v124_v15 = vpop.f32.mrb[1].mxu0 }
  0xdd   :  { %549 = vtanh.f32 %v124_v15 }
  0xdf   :  { %v501_v18 = vpop.f32.mrb[2].mxu0 }
  0xe0   :  { %551 = vtanh.f32 %v501_v18  ;;  %v134_v20 = vpop.f32.mrb[3].mxu0 }
  0xe1   :  { %553 = vtanh.f32 %v134_v20 }
  0xe3   :  { %v504_v22 = vpop.f32.mrb[4].mxu0 }
  0xe4   :  { %555 = vtanh.f32 %v504_v22  ;;  %v144_v25 = vpop.f32.mrb[5].mxu0 }
  0xe5   :  { %557 = vtanh.f32 %v144_v25 }
  0xe6   :  { %v548_v27 = vpop.eup %547 }
  0xe7   :  { %v550_v29 = vpop.eup %549  ;;  %v507_v30 = vpop.f32.mrb[6].mxu0  ;;  %v202_v32 = vmul.f32 %v548_v27, %v199_v24 }
  0xe8   :  { %559 = vtanh.f32 %v507_v30  ;;  %v154_v34 = vpop.f32.mrb[7].mxu0  ;;  %v201_v35 = vmul.f32 %v550_v29, %v199_v24 }
  0xe9   :  { %561 = vtanh.f32 %v154_v34  ;;  %v657_v41 = vadd.f32 %v202_v32, %v187_v31 }
  0xea   :  { %v552_v37 = vpop.eup %551  ;;  %v655_v38 = vadd.f32 %v201_v35, %v186_v28 }
  0xeb   :  { %v554_v40 = vpop.eup %553  ;;  %v204_v43 = vmul.f32 %v552_v37, %v199_v24 }
  0xec   :  { %510 = vmatprep.mubr.msk.f32.mxu1 %vm225_vm1, %v655_v38  ;;  %v203_v45 = vmul.f32 %v554_v40, %v199_v24 }
  0xed   :  { %511 = vmatmul.mubr.msk.f32.vlgmr.msra.gmra.mrb[0].mxu1 %vm225_vm1, %v657_v41  ;;  %v671_v51 = vadd.f32 %v204_v43, %v189_v42 }
  0xee   :  { %v556_v47 = vpop.eup %555  ;;  %v669_v48 = vadd.f32 %v203_v45, %v188_v39 }
  0xef   :  { %v558_v50 = vpop.eup %557  ;;  %v206_v53 = vmul.f32 %v556_v47, %v199_v24 }
  0xf0   :  { %513 = vmatprep.mubr.msk.f32.mxu1 %vm225_vm1, %v669_v48  ;;  %v205_v55 = vmul.f32 %v558_v50, %v199_v24 }
  0xf1   :  { %514 = vmatmul.mubr.msk.f32.gmra.mrb[2].mxu1 %vm225_vm1, %v671_v51  ;;  %v214_v61 = vadd.f32 %v206_v53, %v191_v52 }
  0xf2   :  { %v560_v57 = vpop.eup %559  ;;  %v683_v58 = vadd.f32 %v205_v55, %v190_v49 }
  0xf3   :  { %v562_v60 = vpop.eup %561  ;;  %v208_v63 = vmul.f32 %v560_v57, %v199_v24 }
  0xf4   :  { %516 = vmatprep.mubr.msk.f32.mxu1 %vm225_vm1, %v683_v58  ;;  %v207_v0 = vmul.f32 %v562_v60, %v199_v24 }
  0xf5   :  { %517 = vmatmul.mubr.msk.f32.gmra.mrb[4].mxu1 %vm225_vm1, %v214_v61  ;;  %v690_v2 = vadd.f32 %v208_v63, %v193_v62 }
  0xf6   :  { %v688_v1 = vadd.f32 %v207_v0, %v192_v59 }
  0xf8   :  { %519 = vmatprep.mubr.msk.f32.mxu1 %vm225_vm1, %v688_v1 }
  0xf9   :  { %520 = vmatmul.mubr.msk.f32.gmra.mrb[6].mxu1 %vm225_vm1, %v690_v2 }
 0x1c0   :  { %v512_v4 = vpop.f32.mrb[0].mxu1 }
 0x1c1   :  { %v322_v5 = vadd.f32 %v512_v4, %v448_v3  ;;  %v316_v6 = vpop.f32.mrb[1].mxu1 }
 0x1c2   :  { %v317_v7 = vadd.f32 %v448_v3, %v316_v6 }
 0x1c4   :  { %v515_v8 = vpop.f32.mrb[2].mxu1  ;;  %v527_v9 = vpack.i.bf16 %v322_v5, %v317_v7 }
 0x1c5   :  { %v332_v10 = vadd.f32 %v515_v8, %v448_v3  ;;  %v326_v11 = vpop.f32.mrb[3].mxu1 }
 0x1c6   :  { %v327_v12 = vadd.f32 %v448_v3, %v326_v11  ;;  %528 = vrot.lane.b32.xlu0 %v527_v9, %s563_s9 }
 0x1c8   :  { %v532_v13 = vpack.i.bf16 %v332_v10, %v327_v12  ;;  %v518_v14 = vpop.f32.mrb[4].mxu1 }
 0x1c9   :  { %v342_v15 = vadd.f32 %v518_v14, %v448_v3  ;;  %v336_v16 = vpop.f32.mrb[5].mxu1 }
 0x1ca   :  { %v337_v17 = vadd.f32 %v448_v3, %v336_v16  ;;  %533 = vrot.lane.b32.xlu0 %v532_v13, %s563_s9 }
 0x1cc   :  { %v521_v18 = vpop.f32.mrb[6].mxu1  ;;  %v537_v19 = vpack.i.bf16 %v342_v15, %v337_v17 }
 0x1cd   :  { %v352_v20 = vadd.f32 %v521_v18, %v448_v3  ;;  %v346_v21 = vpop.f32.mrb[7].mxu1 }
 0x1ce   :  { %v347_v22 = vadd.f32 %v448_v3, %v346_v21  ;;  %538 = vrot.lane.b32.xlu1 %v537_v19, %s563_s9 }
 0x1d0   :  { %v542_v23 = vpack.i.bf16 %v352_v20, %v347_v22 }
 0x1d2   :  { %543 = vrot.lane.b32.xlu1 %v542_v23, %s563_s9 }
 0x238   :  { %v529_v24 = vpop.permute.xlu0 %528 }
 0x239   :  { %v531_v25 = vunpack.i.h.bf16 %v529_v24  ;;  %v530_v26 = vunpack.i.l.bf16 %v529_v24 }
 0x23b   :  { %v388_v27 = vsel %vm225_vm1, %v657_v41, %v531_v25  ;;  %v387_v28 = vsel %vm225_vm1, %v655_v38, %v530_v26 }
 0x23c   :  { %v466_v29 = vpack.c.bf16 %v388_v27, %v388_v27  ;;  %v465_v30 = vpack.c.bf16 %v387_v28, %v387_v28  ;;  %v534_v31 = vpop.permute.xlu0 %533 }
 0x23d   :  { %v536_v32 = vunpack.i.h.bf16 %v534_v31  ;;  %v535_v33 = vunpack.i.l.bf16 %v534_v31 }
 0x23e   :  { %429 = vst.msk [vmem:[%s752_s6 + $0x4] sm:$0xf] %vm427_vm2, %v466_v29  ;;  %428 = vst.msk [vmem:[%s752_s6] sm:$0xf] %vm427_vm2, %v465_v30 }
 0x23f   :  { %v390_v34 = vsel %vm225_vm1, %v671_v51, %v536_v32  ;;  %v389_v35 = vsel %vm225_vm1, %v669_v48, %v535_v33 }
 0x240   :  { %v468_v36 = vpack.c.bf16 %v390_v34, %v390_v34  ;;  %v467_v37 = vpack.c.bf16 %v389_v35, %v389_v35  ;;  %v539_v38 = vpop.permute.xlu1 %538 }
 0x241   :  { %v541_v39 = vunpack.i.h.bf16 %v539_v38  ;;  %v540_v40 = vunpack.i.l.bf16 %v539_v38 }
 0x242   :  { %431 = vst.msk [vmem:[%s752_s6 + $0xc] sm:$0xf] %vm427_vm2, %v468_v36  ;;  %430 = vst.msk [vmem:[%s752_s6 + $0x8] sm:$0xf] %vm427_vm2, %v467_v37 }
 0x243   :  { %v392_v41 = vsel %vm225_vm1, %v214_v61, %v541_v39  ;;  %v391_v42 = vsel %vm225_vm1, %v683_v58, %v540_v40 }
 0x244   :  { %v470_v43 = vpack.c.bf16 %v392_v41, %v392_v41  ;;  %v469_v44 = vpack.c.bf16 %v391_v42, %v391_v42  ;;  %v544_v45 = vpop.permute.xlu1 %543 }
 0x245   :  { %v546_v46 = vunpack.i.h.bf16 %v544_v45  ;;  %v545_v47 = vunpack.i.l.bf16 %v544_v45 }
 0x246   :  { %433 = vst.msk [vmem:[%s752_s6 + $0x14] sm:$0xf] %vm427_vm2, %v470_v43  ;;  %432 = vst.msk [vmem:[%s752_s6 + $0x10] sm:$0xf] %vm427_vm2, %v469_v44 }
 0x247   :  { %v394_v48 = vsel %vm225_vm1, %v690_v2, %v546_v46  ;;  %v393_v49 = vsel %vm225_vm1, %v688_v1, %v545_v47 }
 0x248   :  { %v472_v50 = vpack.c.bf16 %v394_v48, %v394_v48  ;;  %v471_v51 = vpack.c.bf16 %v393_v49, %v393_v49 }
 0x24a   :  { %435 = vst.msk [vmem:[%s752_s6 + $0x1c] sm:$0xf] %vm427_vm2, %v472_v50  ;;  %434 = vst.msk [vmem:[%s752_s6 + $0x18] sm:$0xf] %vm427_vm2, %v471_v51 }

// kernel: intent_forward.3
= control target key start
LH: loop header
LB: loop body
LE: loop exit
PB: predicated region body
PF: predicated region fallthrough
CT: control target
= control target key end

     0   :  { %vm43_vm0 = vcmask 64512   ;;  %v2496_v0 = vmov 0.0   ;;  %vm2497_vm1 = vmmov 0   ;;  %s2499_s16 = smov 8   ;;  %s2838_s2 = inlined_call_operand.vmem [shape: f32[8,16], index: 2, kind: input, shape index: {}]   ;;  %s2839_s5 = inlined_call_operand.vmem [shape: f32[1,8], index: 5, kind: input, shape index: {}]   ;;  %s2840_s1 = inlined_call_operand.vmem [shape: bf16[8,8,24], index: 1, kind: input, shape index: {}]   ;;  %s2841_s6 = inlined_call_operand.vmem [shape: f32[1,8], index: 6, kind: input, shape index: {}]   ;;  %s2842_s3 = inlined_call_operand.vmem [shape: f32[8,16], index: 3, kind: input, shape index: {}]   ;;  %s2843_s4 = inlined_call_operand.vmem [shape: f32[8,8], index: 4, kind: input, shape index: {}]   ;;  %s2844_s0 = inlined_call_operand.vmem [shape: s32[8,1], index: 0, kind: input, shape index: {}]   ;;  %s2845_s7 = inlined_call_operand.vmem [shape: f32[8,4], index: 7, kind: input, shape index: {}]   ;;  %s2846_s8 = inlined_call_operand.vmem [shape: f32[1,4], index: 8, kind: input, shape index: {}]   ;;  %s2847_s9 = inlined_call_operand.vmem [shape: f32[8,4], index: 9, kind: output, shape index: {}]  }
   0x1   :  { %2332 = vmatprep.subr.mxu0 %v2496_v0  ;;  %v2555_v1 = vld [vmem:[%s2838_s2] sm:$0xff]  ;;  %2334 = vmatprep.mubr.msk.f32.mxu0 %vm2497_vm1, %v2496_v0  ;;  %45 = vst.msk [vmem:[#allocation3] sm:$0xff] %vm43_vm0, %v2496_v0  ;;  %s2498_s2 = smov 120  }
   0x2   :  { %v2238_v2 = vld [vmem:[%s2839_s5] ss:$0 sm:$0xff]  ;;  %2333 = vmatpush3.msra.mxu0 %v2555_v1  ;;  %2337 = vmatprep.subr.mxu1 %v2496_v0  ;;  %v2614_v28 = vld [vmem:[%s2840_s1 + $0x4] sm:$0xff]  }
   0x3   :  { %v60_v3 = vld [vmem:[%s2840_s1] sm:$0xf]  ;;  %44 = vst.msk [vmem:[#allocation2] sm:$0xff] %vm43_vm0, %v2238_v2  ;;  %2339 = vmatprep.mubr.msk.f32.mxu1 %vm2497_vm1, %v2496_v0  ;;  %2342 = vmatprep.subr.mxu0 %v2496_v0  ;;  %v324_v29 = vunpack.c.l.bf16 %v2614_v28  ;;  %v584_v56 = vunpack.c.h.bf16 %v2614_v28 }
   0x4   :  { %v61_v4 = vunpack.c.l.bf16 %v60_v3  ;;  %v2239_v5 = vld [vmem:[%s2841_s6] ss:$0 sm:$0xff] }
   0x5   :  { %v2585_v7 = vld [vmem:[%s2842_s3] sm:$0xff] }
   0x6   :  { %63 = vrot.lane.b32.xlu0 %v61_v4, %s2498_s2  ;;  %2338 = vmatpush3.msra.mxu1 %v2585_v7  ;;  %v2592_v16 = vld [vmem:[%s2843_s4] sm:$0xff] }
   0x7   :  { %2347 = vmatprep.subr.mxu1 %v2496_v0 }
   0xa   :  { %148 = vrot.lane.b32.xlu0 %v2239_v5, %s2499_s16  ;;  %v58_v6 = vld [vmem:[#allocation2] sm:$0xff] }
   0xb   :  { %2335 = vmatmul.mubr.msk.f32.vlgmr.msra.gmra.mrb[0].mxu0 %vm43_vm0, %v58_v6  ;;  %152 = vrot.lane.b32.xlu1 %v58_v6, %s2499_s16 }
   0xc   :  { %2344 = vmatprep.mubr.msk.f32.mxu0 %vm2497_vm1, %v2496_v0  ;;  %2343 = vmatpush3.msra.mxu0 %v2592_v16 }
   0xd   :  { %2352 = vmatprep.subr.mxu0 %v2496_v0 }
  0x78   :  { %v64_v8 = vpop.permute.xlu0 %63 }
  0x7c   :  { %v2596_v19 = vpop.permute.xlu0 %148 }
  0x7d   :  { %v153_v18 = vpop.permute.xlu1 %152 }
  0xde   :  { %v136_v9 = vpop.f32.mrb[0].mxu0 }
  0xdf   :  { %v137_v10 = vadd.f32 %v136_v9, %v64_v8  ;;  %v2336_v11 = vpop.f32.mrb[1].mxu0 }
  0xe1   :  { %v2242_v12 = vmul.f32 -2.0, %v137_v10 }
  0xe3   :  { %v142_v13 = vmul.f32 1.442695, %v2242_v12 }
  0xe5   :  { %2464 = vpow2.f32 %v142_v13 }
  0xef   :  { %v2465_v14 = vpop.eup %2464 }
  0xf0   :  { %v144_v15 = vadd.f32 1.0, %v2465_v14 }
  0xf2   :  { %2466 = vrcp.f32 %v144_v15 }
  0xfc   :  { %v2467_v17 = vpop.eup %2466 }
  0xfd   :  { %v147_v20 = vsub.f32 1.0, %v2467_v17  ;;  %v155_v21 = vmul.f32 %v2467_v17, %v153_v18 }
  0xff   :  { %v151_v22 = vmul.f32 %v2596_v19, %v147_v20  ;;  %v311_v35 = vmul.f32 %v147_v20, %v58_v6 }
 0x101   :  { %v156_v23 = vadd.f32 %v155_v21, %v151_v22 }
 0x103   :  { %158 = vrot.lane.b32.xlu1 %v156_v23, %s2498_s2 }
 0x107   :  { %326 = vrot.lane.b32.xlu1 %v324_v29, %s2498_s2 }
 0x175   :  { %v159_v24 = vpop.permute.xlu1 %158 }
 0x176   :  { %2340 = vmatmul.mubr.msk.f32.vlgmr.msra.gmra.mrb[0].mxu1 %vm43_vm0, %v159_v24  ;;  %v2670_v24 = vld [vmem:[%s2840_s1 + $0xc] sm:$0xff]  }
 0x177   :  { %2348 = vmatpush3.msra.mxu1 %v2555_v1  ;;  %2349 = vmatprep.mubr.msk.f32.mxu1 %vm2497_vm1, %v2496_v0 }
 0x178   :  { %2357 = vmatprep.subr.mxu1 %v2496_v0 }
 0x179   :  { %v327_v38 = vpop.permute.xlu1 %326 }
 0x249   :  { %v228_v25 = vpop.f32.mrb[0].mxu1 }
 0x24a   :  { %v232_v26 = vmul.f32 %v228_v25, %v61_v4  ;;  %234 = vrot.lane.b32.xlu0 %v228_v25, %s2498_s2  ;;  %v2341_v27 = vpop.f32.mrb[1].mxu1  ;;  %v844_v25 = vunpack.c.l.bf16 %v2670_v24 }
 0x24c   :  { %2345 = vmatmul.mubr.msk.f32.vlgmr.msra.gmra.mrb[2].mxu0 %vm43_vm0, %v232_v26 }
 0x24d   :  { %2353 = vmatpush3.msra.mxu0 %v2585_v7  ;;  %2354 = vmatprep.mubr.msk.f32.mxu0 %vm2497_vm1, %v2496_v0 }
 0x24e   :  { %2362 = vmatprep.subr.mxu0 %v2496_v0 }
 0x2bc   :  { %v235_v30 = vpop.permute.xlu0 %234 }
 0x31f   :  { %v306_v31 = vpop.f32.mrb[2].mxu0 }
 0x320   :  { %v307_v32 = vadd.f32 %v306_v31, %v235_v30  ;;  %v2346_v33 = vpop.f32.mrb[3].mxu0 }
 0x322   :  { %v310_v34 = vmax.f32 %v307_v32, 0.0 }
 0x324   :  { %v312_v36 = vmul.f32 %v2467_v17, %v310_v34 }
 0x326   :  { %v2618_v37 = vadd.f32 %v312_v36, %v311_v35 }
 0x328   :  { %411 = vrot.lane.b32.xlu0 %v2618_v37, %s2499_s16  ;;  %2350 = vmatmul.mubr.msk.f32.vlgmr.msra.gmra.mrb[2].mxu1 %vm43_vm0, %v2618_v37 }
 0x329   :  { %2358 = vmatpush3.msra.mxu1 %v2592_v16  ;;  %2359 = vmatprep.mubr.msk.f32.mxu1 %vm2497_vm1, %v2496_v0 }
 0x32a   :  { %2367 = vmatprep.subr.mxu1 %v2496_v0 }
 0x39a   :  { %v412_v48 = vpop.permute.xlu0 %411 }
 0x3fb   :  { %v398_v39 = vpop.f32.mrb[2].mxu1 }
 0x3fc   :  { %v399_v40 = vadd.f32 %v398_v39, %v327_v38  ;;  %v2351_v41 = vpop.f32.mrb[3].mxu1 }
 0x3fe   :  { %v2247_v42 = vmul.f32 -2.0, %v399_v40 }
 0x400   :  { %v404_v43 = vmul.f32 1.442695, %v2247_v42 }
 0x402   :  { %2468 = vpow2.f32 %v404_v43 }
 0x40c   :  { %v2469_v44 = vpop.eup %2468 }
 0x40d   :  { %v406_v45 = vadd.f32 1.0, %v2469_v44 }
 0x40f   :  { %2470 = vrcp.f32 %v406_v45 }
 0x419   :  { %v2471_v46 = vpop.eup %2470 }
 0x41a   :  { %v409_v47 = vsub.f32 1.0, %v2471_v46  ;;  %v414_v50 = vmul.f32 %v2471_v46, %v412_v48 }
 0x41c   :  { %v410_v49 = vmul.f32 %v409_v47, %v2596_v19  ;;  %v570_v62 = vmul.f32 %v409_v47, %v2618_v37 }
 0x41e   :  { %v415_v51 = vadd.f32 %v414_v50, %v410_v49 }
 0x420   :  { %417 = vrot.lane.b32.xlu1 %v415_v51, %s2498_s2 }
 0x424   :  { %586 = vrot.lane.b32.xlu1 %v584_v56, %s2498_s2 }
 0x492   :  { %v418_v52 = vpop.permute.xlu1 %417 }
 0x493   :  { %2355 = vmatmul.mubr.msk.f32.vlgmr.msra.gmra.mrb[4].mxu0 %vm43_vm0, %v418_v52 }
 0x494   :  { %2363 = vmatpush3.msra.mxu0 %v2555_v1  ;;  %2364 = vmatprep.mubr.msk.f32.mxu0 %vm2497_vm1, %v2496_v0 }
 0x495   :  { %2372 = vmatprep.subr.mxu0 %v2496_v0 }
 0x496   :  { %v587_v3 = vpop.permute.xlu1 %586 }
 0x566   :  { %v487_v53 = vpop.f32.mrb[4].mxu0 }
 0x567   :  { %v491_v54 = vmul.f32 %v487_v53, %v324_v29  ;;  %493 = vrot.lane.b32.xlu0 %v487_v53, %s2498_s2  ;;  %v2356_v55 = vpop.f32.mrb[5].mxu0  ;;  %v1104_v53 = vunpack.c.h.bf16 %v2670_v24 }
 0x569   :  { %2360 = vmatmul.mubr.msk.f32.vlgmr.msra.gmra.mrb[4].mxu1 %vm43_vm0, %v491_v54 }
 0x56a   :  { %2368 = vmatpush3.msra.mxu1 %v2585_v7  ;;  %2369 = vmatprep.mubr.msk.f32.mxu1 %vm2497_vm1, %v2496_v0 }
 0x56b   :  { %2377 = vmatprep.subr.mxu1 %v2496_v0 }
 0x5d9   :  { %v494_v57 = vpop.permute.xlu0 %493 }
 0x63c   :  { %v565_v58 = vpop.f32.mrb[4].mxu1 }
 0x63d   :  { %v566_v59 = vadd.f32 %v565_v58, %v494_v57  ;;  %v2361_v60 = vpop.f32.mrb[5].mxu1 }
 0x63f   :  { %v569_v61 = vmax.f32 %v566_v59, 0.0 }
 0x641   :  { %v571_v63 = vmul.f32 %v2471_v46, %v569_v61 }
 0x643   :  { %v2644_v2 = vadd.f32 %v571_v63, %v570_v62 }
 0x645   :  { %671 = vrot.lane.b32.xlu0 %v2644_v2, %s2499_s16  ;;  %2365 = vmatmul.mubr.msk.f32.vlgmr.msra.gmra.mrb[6].mxu0 %vm43_vm0, %v2644_v2 }
 0x646   :  { %2373 = vmatpush3.msra.mxu0 %v2592_v16  ;;  %2374 = vmatprep.mubr.msk.f32.mxu0 %vm2497_vm1, %v2496_v0 }
 0x647   :  { %2382 = vmatprep.subr.mxu0 %v2496_v0 }
 0x6b7   :  { %v672_v14 = vpop.permute.xlu0 %671 }
 0x718   :  { %v658_v4 = vpop.f32.mrb[6].mxu0 }
 0x719   :  { %v659_v5 = vadd.f32 %v658_v4, %v587_v3  ;;  %v2366_v6 = vpop.f32.mrb[7].mxu0 }
 0x71b   :  { %v2252_v8 = vmul.f32 -2.0, %v659_v5 }
 0x71d   :  { %v664_v9 = vmul.f32 1.442695, %v2252_v8 }
 0x71f   :  { %2472 = vpow2.f32 %v664_v9 }
 0x729   :  { %v2473_v10 = vpop.eup %2472 }
 0x72a   :  { %v666_v11 = vadd.f32 1.0, %v2473_v10 }
 0x72c   :  { %2474 = vrcp.f32 %v666_v11 }
 0x736   :  { %v2475_v12 = vpop.eup %2474 }
 0x737   :  { %v669_v13 = vsub.f32 1.0, %v2475_v12  ;;  %v674_v17 = vmul.f32 %v2475_v12, %v672_v14 }
 0x739   :  { %v670_v15 = vmul.f32 %v669_v13, %v2596_v19  ;;  %v830_v31 = vmul.f32 %v669_v13, %v2644_v2 }
 0x73b   :  { %v675_v18 = vadd.f32 %v674_v17, %v670_v15 }
 0x73d   :  { %677 = vrot.lane.b32.xlu1 %v675_v18, %s2498_s2 }
 0x741   :  { %846 = vrot.lane.b32.xlu1 %v844_v25, %s2498_s2 }
 0x7af   :  { %v678_v20 = vpop.permute.xlu1 %677 }
 0x7b0   :  { %2370 = vmatmul.mubr.msk.f32.vlgmr.msra.gmra.mrb[6].mxu1 %vm43_vm0, %v678_v20 }
 0x7b1   :  { %2378 = vmatpush3.msra.mxu1 %v2555_v1  ;;  %2379 = vmatprep.mubr.msk.f32.mxu1 %vm2497_vm1, %v2496_v0 }
 0x7b2   :  { %2387 = vmatprep.subr.mxu1 %v2496_v0 }
 0x7b3   :  { %v847_v34 = vpop.permute.xlu1 %846 }
 0x883   :  { %v747_v21 = vpop.f32.mrb[6].mxu1 }
 0x884   :  { %v751_v22 = vmul.f32 %v747_v21, %v584_v56  ;;  %753 = vrot.lane.b32.xlu0 %v747_v21, %s2498_s2  ;;  %v2371_v23 = vpop.f32.mrb[7].mxu1 }
 0x886   :  { %2375 = vmatmul.mubr.msk.f32.vlgmr.msra.gmra.mrb[8].mxu0 %vm43_vm0, %v751_v22  ;;  %v2727_v22 = vld [vmem:[%s2840_s1 + $0x14] sm:$0xff]  }
 0x887   :  { %2383 = vmatpush3.msra.mxu0 %v2585_v7  ;;  %2384 = vmatprep.mubr.msk.f32.mxu0 %vm2497_vm1, %v2496_v0  ;;  %v1364_v23 = vunpack.c.l.bf16 %v2727_v22 }
 0x888   :  { %2392 = vmatprep.subr.mxu0 %v2496_v0 }
 0x8f6   :  { %v754_v26 = vpop.permute.xlu0 %753 }
 0x959   :  { %v825_v27 = vpop.f32.mrb[8].mxu0 }
 0x95a   :  { %v826_v28 = vadd.f32 %v825_v27, %v754_v26  ;;  %v2376_v29 = vpop.f32.mrb[9].mxu0 }
 0x95c   :  { %v829_v30 = vmax.f32 %v826_v28, 0.0 }
 0x95e   :  { %v831_v32 = vmul.f32 %v2475_v12, %v829_v30 }
 0x960   :  { %v2675_v33 = vadd.f32 %v831_v32, %v830_v31 }
 0x962   :  { %931 = vrot.lane.b32.xlu0 %v2675_v33, %s2499_s16  ;;  %2380 = vmatmul.mubr.msk.f32.vlgmr.msra.gmra.mrb[8].mxu1 %vm43_vm0, %v2675_v33 }
 0x963   :  { %2388 = vmatpush3.msra.mxu1 %v2592_v16  ;;  %2389 = vmatprep.mubr.msk.f32.mxu1 %vm2497_vm1, %v2496_v0 }
 0x964   :  { %2397 = vmatprep.subr.mxu1 %v2496_v0 }
 0x9d4   :  { %v932_v45 = vpop.permute.xlu0 %931 }
 0xa35   :  { %v918_v35 = vpop.f32.mrb[8].mxu1 }
 0xa36   :  { %v919_v36 = vadd.f32 %v918_v35, %v847_v34  ;;  %v2381_v38 = vpop.f32.mrb[9].mxu1 }
 0xa38   :  { %v2257_v39 = vmul.f32 -2.0, %v919_v36 }
 0xa3a   :  { %v924_v40 = vmul.f32 1.442695, %v2257_v39 }
 0xa3c   :  { %2476 = vpow2.f32 %v924_v40 }
 0xa46   :  { %v2477_v41 = vpop.eup %2476 }
 0xa47   :  { %v926_v42 = vadd.f32 1.0, %v2477_v41 }
 0xa49   :  { %2478 = vrcp.f32 %v926_v42 }
 0xa53   :  { %v2479_v43 = vpop.eup %2478 }
 0xa54   :  { %v929_v44 = vsub.f32 1.0, %v2479_v43  ;;  %v934_v47 = vmul.f32 %v2479_v43, %v932_v45 }
 0xa56   :  { %v930_v46 = vmul.f32 %v929_v44, %v2596_v19  ;;  %v1090_v59 = vmul.f32 %v929_v44, %v2675_v33 }
 0xa58   :  { %v935_v48 = vadd.f32 %v934_v47, %v930_v46 }
 0xa5a   :  { %937 = vrot.lane.b32.xlu1 %v935_v48, %s2498_s2 }
 0xa5e   :  { %1106 = vrot.lane.b32.xlu1 %v1104_v53, %s2498_s2 }
 0xacc   :  { %v938_v49 = vpop.permute.xlu1 %937 }
 0xacd   :  { %2385 = vmatmul.mubr.msk.f32.vlgmr.msra.gmra.mrb[10].mxu0 %vm43_vm0, %v938_v49 }
 0xace   :  { %2393 = vmatpush3.msra.mxu0 %v2555_v1  ;;  %2394 = vmatprep.mubr.msk.f32.mxu0 %vm2497_vm1, %v2496_v0 }
 0xacf   :  { %2402 = vmatprep.subr.mxu0 %v2496_v0 }
 0xad0   :  { %v1107_v62 = vpop.permute.xlu1 %1106 }
 0xba0   :  { %v1007_v50 = vpop.f32.mrb[10].mxu0 }
 0xba1   :  { %v1011_v51 = vmul.f32 %v1007_v50, %v844_v25  ;;  %1013 = vrot.lane.b32.xlu0 %v1007_v50, %s2498_s2  ;;  %v2386_v52 = vpop.f32.mrb[11].mxu0 }
 0xba2   :  { %v1624_v52 = vunpack.c.h.bf16 %v2727_v22  ;;  %v2786_v22 = vld [vmem:[%s2840_s1 + $0x1c] sm:$0xf] }
 0xba3   :  { %2390 = vmatmul.mubr.msk.f32.vlgmr.msra.gmra.mrb[10].mxu1 %vm43_vm0, %v1011_v51 }
 0xba4   :  { %2398 = vmatpush3.msra.mxu1 %v2585_v7  ;;  %2399 = vmatprep.mubr.msk.f32.mxu1 %vm2497_vm1, %v2496_v0 }
 0xba5   :  { %2407 = vmatprep.subr.mxu1 %v2496_v0 }
 0xc13   :  { %v1014_v54 = vpop.permute.xlu0 %1013 }
 0xc76   :  { %v1085_v55 = vpop.f32.mrb[10].mxu1 }
 0xc77   :  { %v1086_v56 = vadd.f32 %v1085_v55, %v1014_v54  ;;  %v2391_v57 = vpop.f32.mrb[11].mxu1 }
 0xc79   :  { %v1089_v58 = vmax.f32 %v1086_v56, 0.0 }
 0xc7b   :  { %v1091_v60 = vmul.f32 %v2479_v43, %v1089_v58 }
 0xc7d   :  { %v2701_v61 = vadd.f32 %v1091_v60, %v1090_v59 }
 0xc7f   :  { %1191 = vrot.lane.b32.xlu0 %v2701_v61, %s2499_s16  ;;  %2395 = vmatmul.mubr.msk.f32.vlgmr.msra.gmra.mrb[12].mxu0 %vm43_vm0, %v2701_v61 }
 0xc80   :  { %2403 = vmatpush3.msra.mxu0 %v2592_v16  ;;  %2404 = vmatprep.mubr.msk.f32.mxu0 %vm2497_vm1, %v2496_v0 }
 0xc81   :  { %2412 = vmatprep.subr.mxu0 %v2496_v0 }
 0xcf1   :  { %v1192_v12 = vpop.permute.xlu0 %1191 }
 0xd52   :  { %v1178_v63 = vpop.f32.mrb[12].mxu0 }
 0xd53   :  { %v1179_v3 = vadd.f32 %v1178_v63, %v1107_v62  ;;  %v2396_v4 = vpop.f32.mrb[13].mxu0 }
 0xd55   :  { %v2262_v5 = vmul.f32 -2.0, %v1179_v3 }
 0xd57   :  { %v1184_v6 = vmul.f32 1.442695, %v2262_v5 }
 0xd59   :  { %2480 = vpow2.f32 %v1184_v6 }
 0xd63   :  { %v2481_v8 = vpop.eup %2480 }
 0xd64   :  { %v1186_v9 = vadd.f32 1.0, %v2481_v8 }
 0xd66   :  { %2482 = vrcp.f32 %v1186_v9 }
 0xd70   :  { %v2483_v10 = vpop.eup %2482 }
 0xd71   :  { %v1189_v11 = vsub.f32 1.0, %v2483_v10  ;;  %v1194_v14 = vmul.f32 %v2483_v10, %v1192_v12 }
 0xd73   :  { %v1190_v13 = vmul.f32 %v1189_v11, %v2596_v19  ;;  %v1350_v29 = vmul.f32 %v1189_v11, %v2701_v61 }
 0xd75   :  { %v1195_v15 = vadd.f32 %v1194_v14, %v1190_v13 }
 0xd77   :  { %1197 = vrot.lane.b32.xlu1 %v1195_v15, %s2498_s2 }
 0xd7b   :  { %1366 = vrot.lane.b32.xlu1 %v1364_v23, %s2498_s2 }
 0xde9   :  { %v1198_v17 = vpop.permute.xlu1 %1197 }
 0xdea   :  { %2400 = vmatmul.mubr.msk.f32.vlgmr.msra.gmra.mrb[12].mxu1 %vm43_vm0, %v1198_v17 }
 0xdeb   :  { %2408 = vmatpush3.msra.mxu1 %v2555_v1  ;;  %2409 = vmatprep.mubr.msk.f32.mxu1 %vm2497_vm1, %v2496_v0 }
 0xdec   :  { %2417 = vmatprep.subr.mxu1 %v2496_v0 }
 0xded   :  { %v1367_v32 = vpop.permute.xlu1 %1366 }
 0xebd   :  { %v1267_v18 = vpop.f32.mrb[12].mxu1 }
 0xebe   :  { %v1271_v20 = vmul.f32 %v1267_v18, %v1104_v53  ;;  %1273 = vrot.lane.b32.xlu0 %v1267_v18, %s2498_s2  ;;  %v2401_v21 = vpop.f32.mrb[13].mxu1 }
 0xec0   :  { %2405 = vmatmul.mubr.msk.f32.vlgmr.msra.gmra.mrb[14].mxu0 %vm43_vm0, %v1271_v20 }
 0xec1   :  { %2413 = vmatpush3.msra.mxu0 %v2585_v7  ;;  %2414 = vmatprep.mubr.msk.f32.mxu0 %vm2497_vm1, %v2496_v0 }
 0xec2   :  { %2422 = vmatprep.subr.mxu0 %v2496_v0 }
 0xf30   :  { %v1274_v24 = vpop.permute.xlu0 %1273 }
 0xf93   :  { %v1345_v25 = vpop.f32.mrb[14].mxu0 }
 0xf94   :  { %v1346_v26 = vadd.f32 %v1345_v25, %v1274_v24  ;;  %v2406_v27 = vpop.f32.mrb[15].mxu0  ;;  %v55_v25 = vld [vmem:[%s2844_s0] sm:$0xff] }
 0xf96   :  { %v1349_v28 = vmax.f32 %v1346_v26, 0.0 }
 0xf98   :  { %v1351_v30 = vmul.f32 %v2483_v10, %v1349_v28 }
 0xf9a   :  { %v2732_v31 = vadd.f32 %v1351_v30, %v1350_v29  ;;  %v2240_v29 = vadd.s32 4294967295, %v55_v25 }
 0xf9c   :  { %1451 = vrot.lane.b32.xlu0 %v2732_v31, %s2499_s16  ;;  %2410 = vmatmul.mubr.msk.f32.vlgmr.msra.gmra.mrb[14].mxu1 %vm43_vm0, %v2732_v31  ;;  %vm315_vm2 = vcmp.eq.s32.totalorder %v2240_v29, 0  ;;  %vm1095_vm3 = vcmp.eq.s32.totalorder %v2240_v29, 3  ;;  %vm1615_vm4 = vcmp.eq.s32.totalorder %v2240_v29, 5  ;;  %vm575_vm5 = vcmp.eq.s32.totalorder %v2240_v29, 1 }
 0xf9d   :  { %2418 = vmatpush3.msra.mxu1 %v2592_v16  ;;  %2419 = vmatprep.mubr.msk.f32.mxu1 %vm2497_vm1, %v2496_v0  ;;  %vm835_vm6 = vcmp.eq.s32.totalorder %v2240_v29, 2  ;;  %vm1355_vm7 = vcmp.eq.s32.totalorder %v2240_v29, 4  ;;  %vm1875_vm8 = vcmp.eq.s32.totalorder %v2240_v29, 6  ;;  %vm2135_vm9 = vcmp.eq.s32.totalorder %v2240_v29, 7 }
 0xf9e   :  { %2427 = vmatprep.subr.mxu1 %v2496_v0 }
0x100e   :  { %v1452_v44 = vpop.permute.xlu0 %1451 }
0x106f   :  { %v1438_v34 = vpop.f32.mrb[14].mxu1 }
0x1070   :  { %v1439_v35 = vadd.f32 %v1438_v34, %v1367_v32  ;;  %v2411_v36 = vpop.f32.mrb[15].mxu1 }
0x1072   :  { %v2267_v38 = vmul.f32 -2.0, %v1439_v35 }
0x1074   :  { %v1444_v39 = vmul.f32 1.442695, %v2267_v38 }
0x1076   :  { %2484 = vpow2.f32 %v1444_v39 }
0x1080   :  { %v2485_v40 = vpop.eup %2484 }
0x1081   :  { %v1446_v41 = vadd.f32 1.0, %v2485_v40 }
0x1083   :  { %2486 = vrcp.f32 %v1446_v41 }
0x108d   :  { %v2487_v42 = vpop.eup %2486 }
0x108e   :  { %v1449_v43 = vsub.f32 1.0, %v2487_v42  ;;  %v1454_v46 = vmul.f32 %v2487_v42, %v1452_v44 }
0x1090   :  { %v1450_v45 = vmul.f32 %v1449_v43, %v2596_v19  ;;  %v1610_v58 = vmul.f32 %v1449_v43, %v2732_v31 }
0x1092   :  { %v1455_v47 = vadd.f32 %v1454_v46, %v1450_v45 }
0x1094   :  { %1457 = vrot.lane.b32.xlu1 %v1455_v47, %s2498_s2 }
0x1098   :  { %1626 = vrot.lane.b32.xlu1 %v1624_v52, %s2498_s2 }
0x1106   :  { %v1458_v48 = vpop.permute.xlu1 %1457 }
0x1107   :  { %2415 = vmatmul.mubr.msk.f32.vlgmr.msra.gmra.mrb[16].mxu0 %vm43_vm0, %v1458_v48 }
0x1108   :  { %2423 = vmatpush3.msra.mxu0 %v2555_v1  ;;  %2424 = vmatprep.mubr.msk.f32.mxu0 %vm2497_vm1, %v2496_v0 }
0x1109   :  { %2432 = vmatprep.subr.mxu0 %v2496_v0 }
0x110a   :  { %v1627_v62 = vpop.permute.xlu1 %1626 }
0x11da   :  { %v1527_v49 = vpop.f32.mrb[16].mxu0 }
0x11db   :  { %v1531_v50 = vmul.f32 %v1527_v49, %v1364_v23  ;;  %1533 = vrot.lane.b32.xlu0 %v1527_v49, %s2498_s2  ;;  %v2416_v51 = vpop.f32.mrb[17].mxu0  ;;  %v1884_v23 = vunpack.c.l.bf16 %v2786_v22 }
0x11dd   :  { %2420 = vmatmul.mubr.msk.f32.vlgmr.msra.gmra.mrb[16].mxu1 %vm43_vm0, %v1531_v50 }
0x11de   :  { %2428 = vmatpush3.msra.mxu1 %v2585_v7  ;;  %2429 = vmatprep.mubr.msk.f32.mxu1 %vm2497_vm1, %v2496_v0 }
0x11df   :  { %2437 = vmatprep.subr.mxu1 %v2496_v0 }
0x124d   :  { %v1534_v53 = vpop.permute.xlu0 %1533 }
0x12b0   :  { %v1605_v54 = vpop.f32.mrb[16].mxu1 }
0x12b1   :  { %v1606_v55 = vadd.f32 %v1605_v54, %v1534_v53  ;;  %v2421_v56 = vpop.f32.mrb[17].mxu1 }
0x12b3   :  { %v1609_v57 = vmax.f32 %v1606_v55, 0.0 }
0x12b5   :  { %v1611_v59 = vmul.f32 %v2487_v42, %v1609_v57 }
0x12b7   :  { %v2758_v60 = vadd.f32 %v1611_v59, %v1610_v58 }
0x12b9   :  { %1711 = vrot.lane.b32.xlu0 %v2758_v60, %s2499_s16  ;;  %2425 = vmatmul.mubr.msk.f32.vlgmr.msra.gmra.mrb[18].mxu0 %vm43_vm0, %v2758_v60 }
0x12ba   :  { %2433 = vmatpush3.msra.mxu0 %v2592_v16  ;;  %2434 = vmatprep.mubr.msk.f32.mxu0 %vm2497_vm1, %v2496_v0 }
0x12bb   :  { %2442 = vmatprep.subr.mxu0 %v2496_v0 }
0x132b   :  { %v1712_v12 = vpop.permute.xlu0 %1711 }
0x138c   :  { %v1698_v63 = vpop.f32.mrb[18].mxu0 }
0x138d   :  { %v1699_v3 = vadd.f32 %v1698_v63, %v1627_v62  ;;  %v2426_v4 = vpop.f32.mrb[19].mxu0  ;;  %v2149_v62 = vld [vmem:[%s2845_s7] sm:$0xff] }
0x138f   :  { %v2272_v5 = vmul.f32 -2.0, %v1699_v3 }
0x1391   :  { %v1704_v6 = vmul.f32 1.442695, %v2272_v5  ;;  %v59_v5 = vld [vmem:[#allocation3] sm:$0xff] }
0x1393   :  { %2488 = vpow2.f32 %v1704_v6 }
0x139d   :  { %v2489_v8 = vpop.eup %2488 }
0x139e   :  { %v1706_v9 = vadd.f32 1.0, %v2489_v8 }
0x13a0   :  { %2490 = vrcp.f32 %v1706_v9 }
0x13aa   :  { %v2491_v10 = vpop.eup %2490 }
0x13ab   :  { %v1709_v11 = vsub.f32 1.0, %v2491_v10  ;;  %v1714_v14 = vmul.f32 %v2491_v10, %v1712_v12 }
0x13ad   :  { %v1710_v13 = vmul.f32 %v1709_v11, %v2596_v19  ;;  %v1870_v30 = vmul.f32 %v1709_v11, %v2758_v60 }
0x13af   :  { %v1715_v15 = vadd.f32 %v1714_v14, %v1710_v13 }
0x13b1   :  { %1717 = vrot.lane.b32.xlu1 %v1715_v15, %s2498_s2 }
0x13b5   :  { %1886 = vrot.lane.b32.xlu1 %v1884_v23, %s2498_s2 }
0x1423   :  { %v1718_v17 = vpop.permute.xlu1 %1717 }
0x1424   :  { %2430 = vmatmul.mubr.msk.f32.vlgmr.msra.gmra.mrb[18].mxu1 %vm43_vm0, %v1718_v17 }
0x1425   :  { %2438 = vmatpush3.msra.mxu1 %v2555_v1  ;;  %2439 = vmatprep.mubr.msk.f32.mxu1 %vm2497_vm1, %v2496_v0  ;;  %v2500_v1 = vmov 0  }
0x1426   :  { %2447 = vmatprep.subr.mxu1 %v2496_v0  ;;  %2462 = vset.pattern.permute.xlu0 %v2500_v1  ;;  %v316_v35 = vsel %vm315_vm2, 1, %v2500_v1  ;;  %v1096_v36 = vsel %vm1095_vm3, 1, %v2500_v1  ;;  %v1616_v38 = vsel %vm1615_vm4, 1, %v2500_v1  ;;  %v836_v53 = vsel %vm835_vm6, 1, %v2500_v1 }
0x1427   :  { %2463 = vset.pattern.permute.xlu1 %v2500_v1  ;;  %v1887_v39 = vpop.permute.xlu1 %1886  ;;  %v1356_v54 = vsel %vm1355_vm7, 1, %v2500_v1  ;;  %v1876_v55 = vsel %vm1875_vm8, 1, %v2500_v1  ;;  %v2136_v56 = vsel %vm2135_vm9, 1, %v2500_v1  ;;  %vm2232_vm3 = vcmask 31744  }
0x14f7   :  { %v1787_v18 = vpop.f32.mrb[18].mxu1 }
0x14f8   :  { %v1791_v20 = vmul.f32 %v1787_v18, %v1624_v52  ;;  %1793 = vrot.lane.b32.xlu0 %v1787_v18, %s2498_s2  ;;  %v2431_v21 = vpop.f32.mrb[19].mxu1  ;;  %v576_v52 = vsel %vm575_vm5, 1, %v2500_v1 }
0x14fa   :  { %2435 = vmatmul.mubr.msk.f32.vlgmr.msra.gmra.mrb[20].mxu0 %vm43_vm0, %v1791_v20 }
0x14fb   :  { %2443 = vmatpush3.msra.mxu0 %v2585_v7  ;;  %2444 = vmatprep.mubr.msk.f32.mxu0 %vm2497_vm1, %v2496_v0 }
0x14fc   :  { %2452 = vmatprep.subr.mxu0 %v2496_v0 }
0x156a   :  { %v1794_v7 = vpop.permute.xlu0 %1793 }
0x15cd   :  { %v1865_v24 = vpop.f32.mrb[20].mxu0 }
0x15ce   :  { %v1866_v26 = vadd.f32 %v1865_v24, %v1794_v7  ;;  %v2436_v27 = vpop.f32.mrb[21].mxu0 }
0x15d0   :  { %v1869_v28 = vmax.f32 %v1866_v26, 0.0 }
0x15d2   :  { %v1871_v32 = vmul.f32 %v2491_v10, %v1869_v28 }
0x15d4   :  { %v2794_v34 = vadd.f32 %v1871_v32, %v1870_v30 }
0x15d6   :  { %1971 = vrot.lane.b32.xlu0 %v2794_v34, %s2499_s16  ;;  %2440 = vmatmul.mubr.msk.f32.vlgmr.msra.gmra.mrb[20].mxu1 %vm43_vm0, %v2794_v34 }
0x15d7   :  { %2448 = vmatpush3.msra.mxu1 %v2592_v16  ;;  %2449 = vmatprep.mubr.msk.f32.mxu1 %vm2497_vm1, %v2496_v0 }
0x15da   :  { %318 = vperm.xlu0 %2462, %v316_v35  }
0x15de   :  { %1098 = vperm.xlu0 %2462, %v1096_v36  }
0x15e2   :  { %1618 = vperm.xlu0 %2462, %v1616_v38  }
0x1648   :  { %v1972_v48 = vpop.permute.xlu0 %1971 }
0x1659   :  { %v319_v3 = vpop.permute.xlu0 %318 }
0x165a   :  { %vm320_vm10 = vcmp.eq.s32.totalorder %v319_v3, 1 }
0x165b   :  { %v321_v9 = vsel %vm320_vm10, %v2618_v37, %v59_v5 }
0x16a9   :  { %v1958_v40 = vpop.f32.mrb[20].mxu1 }
0x16aa   :  { %v1959_v41 = vadd.f32 %v1958_v40, %v1887_v39  ;;  %v2441_v42 = vpop.f32.mrb[21].mxu1 }
0x16ac   :  { %v2277_v43 = vmul.f32 -2.0, %v1959_v41 }
0x16ae   :  { %v1964_v44 = vmul.f32 1.442695, %v2277_v43 }
0x16b0   :  { %2492 = vpow2.f32 %v1964_v44 }
0x16ba   :  { %v2493_v16 = vpop.eup %2492 }
0x16bb   :  { %v1966_v45 = vadd.f32 1.0, %v2493_v16 }
0x16bd   :  { %2494 = vrcp.f32 %v1966_v45 }
0x16c7   :  { %v2495_v46 = vpop.eup %2494 }
0x16c8   :  { %v1969_v47 = vsub.f32 1.0, %v2495_v46  ;;  %v1974_v50 = vmul.f32 %v2495_v46, %v1972_v48 }
0x16ca   :  { %v1970_v49 = vmul.f32 %v1969_v47, %v2596_v19  ;;  %v2130_v37 = vmul.f32 %v1969_v47, %v2794_v34 }
0x16cc   :  { %v1975_v51 = vadd.f32 %v1974_v50, %v1970_v49 }
0x16ce   :  { %1977 = vrot.lane.b32.xlu1 %v1975_v51, %s2498_s2 }
0x16d2   :  { %578 = vperm.xlu1 %2463, %v576_v52  }
0x16d6   :  { %838 = vperm.xlu1 %2463, %v836_v53  }
0x16da   :  { %1358 = vperm.xlu1 %2463, %v1356_v54  }
0x16de   :  { %1878 = vperm.xlu1 %2463, %v1876_v55  }
0x16e2   :  { %2138 = vperm.xlu1 %2463, %v2136_v56  }
0x1740   :  { %v1978_v19 = vpop.permute.xlu1 %1977 }
0x1741   :  { %2445 = vmatmul.mubr.msk.f32.vlgmr.msra.gmra.mrb[22].mxu0 %vm43_vm0, %v1978_v19 }
0x1742   :  { %2454 = vmatprep.mubr.msk.f32.mxu0 %vm2497_vm1, %v2496_v0  ;;  %2453 = vmatpush3.msra.mxu0 %v2149_v62  ;;  %v1099_v0 = vpop.permute.xlu0 %1098 }
0x1743   :  { %vm1100_vm13 = vcmp.eq.s32.totalorder %v1099_v0, 1 }
0x1746   :  { %v1619_v8 = vpop.permute.xlu0 %1618 }
0x1747   :  { %vm1620_vm15 = vcmp.eq.s32.totalorder %v1619_v8, 1 }
0x1751   :  { %v579_v63 = vpop.permute.xlu1 %578 }
0x1752   :  { %vm580_vm11 = vcmp.eq.s32.totalorder %v579_v63, 1 }
0x1753   :  { %v581_v10 = vsel %vm580_vm11, %v2644_v2, %v321_v9 }
0x1755   :  { %v839_v4 = vpop.permute.xlu1 %838 }
0x1756   :  { %vm840_vm12 = vcmp.eq.s32.totalorder %v839_v4, 1 }
0x1757   :  { %v841_v11 = vsel %vm840_vm12, %v2675_v33, %v581_v10 }
0x1758   :  { %v1101_v18 = vsel %vm1100_vm13, %v2701_v61, %v841_v11 }
0x1759   :  { %v1359_v6 = vpop.permute.xlu1 %1358 }
0x175a   :  { %vm1360_vm14 = vcmp.eq.s32.totalorder %v1359_v6, 1 }
0x175b   :  { %v1361_v21 = vsel %vm1360_vm14, %v2732_v31, %v1101_v18  ;;  %v2280_v31 = vld [vmem:[%s2846_s8] ss:$0 sm:$0xff] }
0x175c   :  { %v1621_v33 = vsel %vm1620_vm15, %v2758_v60, %v1361_v21 }
0x175d   :  { %v1879_v14 = vpop.permute.xlu1 %1878 }
0x175e   :  { %vm1880_vm1 = vcmp.eq.s32.totalorder %v1879_v14, 1 }
0x1761   :  { %v2139_v1 = vpop.permute.xlu1 %2138 }
0x1762   :  { %vm2140_vm2 = vcmp.eq.s32.totalorder %v2139_v1, 1 }
0x1814   :  { %v2047_v57 = vpop.f32.mrb[22].mxu0 }
0x1815   :  { %v2051_v58 = vmul.f32 %v2047_v57, %v1884_v23  ;;  %v2446_v59 = vpop.f32.mrb[23].mxu0  ;;  %2053 = vrot.lane.b32.xlu0 %v2047_v57, %s2498_s2  ;;  %v1881_v23 = vsel %vm1880_vm1, %v2794_v34, %v1621_v33 }
0x1817   :  { %2450 = vmatmul.mubr.msk.f32.vlgmr.msra.gmra.mrb[22].mxu1 %vm43_vm0, %v2051_v58 }
0x1887   :  { %v2054_v12 = vpop.permute.xlu0 %2053 }
0x18ea   :  { %v2125_v13 = vpop.f32.mrb[22].mxu1 }
0x18eb   :  { %v2126_v15 = vadd.f32 %v2125_v13, %v2054_v12  ;;  %v2451_v17 = vpop.f32.mrb[23].mxu1 }
0x18ed   :  { %v2129_v20 = vmax.f32 %v2126_v15, 0.0 }
0x18ef   :  { %v2131_v2 = vmul.f32 %v2495_v46, %v2129_v20 }
0x18f1   :  { %v2132_v22 = vadd.f32 %v2131_v2, %v2130_v37 }
0x18f3   :  { %v2141_v7 = vsel %vm2140_vm2, %v2132_v22, %v1881_v23  ;;  %2142 = vst.msk [vmem:[#allocation2] sm:$0xff] %vm43_vm0, %v2132_v22 }
0x18f4   :  { %2143 = vst.msk [vmem:[#allocation3] sm:$0xff] %vm43_vm0, %v2141_v7  ;;  %v2147_v61 = vmax.f32 %v2141_v7, 0.0 }
0x18f6   :  { %v2148_v24 = vmin.f32 %v2147_v61, 1.0 }
0x18f8   :  { %2455 = vmatmul.mubr.msk.f32.vlgmr.msra.gmra.mrb[24].mxu0 %vm43_vm0, %v2148_v24 }
0x19cb   :  { %v2226_v25 = vpop.f32.mrb[24].mxu0 }
0x19cc   :  { %v2227_v26 = vadd.f32 %v2280_v31, %v2226_v25  ;;  %v2456_v60 = vpop.f32.mrb[25].mxu0 }
0x19ce   :  { %v2230_v27 = vmax.f32 %v2227_v26, 0.0 }
0x19d0   :  { %v2231_v28 = vmin.f32 %v2230_v27, 1.0 }
0x19d2   :  { %2233 = vst.msk [vmem:[%s2847_s9] sm:$0xff] %vm2232_vm3, %v2231_v28 }

</bundles_post_ra>
